<compile_context>
chip_gen: v7x
topology: tpu7x:2x2x1
jax: 0.10.0
libtpu: 0.0.40
codegen_flags: <defaults>
</compile_context>

<pallas_src>
import numpy as np
import jax
import jax.numpy as jnp
from jax import lax
from jax.experimental import pallas as pl
from jax.experimental.pallas import tpu as pltpu

_BF16 = jnp.bfloat16
_F32 = jnp.float32


# ---------------------------------------------------------------------------
# Shared in-kernel pieces
# ---------------------------------------------------------------------------
def _gru_step(xz, xr, xm, h, acc, wzh, wrh, wmh):
    """One GRU timestep.

    xz/xr/xm: [Bb, H] f32 x-side gate inputs (independent of h, off-chain).
    h, acc:   [Bb, H] f32 loop carries (stay in vregs).
    wzh/wrh/wmh: bf16 [H, H] MXU operands.

    Only h@wzh, h@wrh (independent of each other) and (r*h)@wmh are on the
    serial recurrence chain; keeping them as separate [H,H] matmuls means all
    chained results live in lanes 0..H-1 with no XLU lane relayout on-chain.
    GRU biases are fill_(0.0) in the reference __init__, so they are omitted.
    """
    h_b = h.astype(_BF16)
    hz = jnp.dot(h_b, wzh, preferred_element_type=_F32)            # [Bb, H]
    hr = jnp.dot(h_b, wrh, preferred_element_type=_F32)            # [Bb, H]
    z = jax.nn.sigmoid(xz + hz)
    r = jax.nn.sigmoid(xr + hr)
    hm = jnp.dot((r * h).astype(_BF16), wmh, preferred_element_type=_F32)
    h_hat = jnp.tanh(xm + hm)
    h_new = h + z * (h_hat - h)            # == (1-z)*h + z*h_hat, one fewer op
    return h_new, acc + h_new


def _prediction_head(mean_h, w1, b1, w2, b2, out_dtype):
    """Linear(H,64) -> ReLU -> Linear(64, padded C). bf16 MXU, f32 accum."""
    hid = jnp.maximum(
        jnp.dot(mean_h.astype(_BF16), w1, preferred_element_type=_F32) + b1,
        0.0)
    logits = jnp.dot(hid.astype(_BF16), w2, preferred_element_type=_F32) + b2
    return logits.astype(out_dtype)


# ---------------------------------------------------------------------------
# Kernel A: small vocab -- one-hot gather of the folded table inside the kernel
# ---------------------------------------------------------------------------
def _gru_gather_kernel(sent_ref,    # [Bb, S] int32 token ids (one batch tile)
                       emb_wx_ref,  # [V, 3H] bf16  (= emb @ [wzx|wrx|wmx])
                       wzh_ref, wrh_ref, wmh_ref,   # [H, H] bf16 each
                       w1_ref, b1_ref,              # [H, 64] bf16, [1, 64] f32
                       w2_ref, b2_ref,              # [64, CP] bf16, [1, CP] f32
                       out_ref):                    # [Bb, CP] f32
    Bb, S = sent_ref.shape
    V = emb_wx_ref.shape[0]
    H = wzh_ref.shape[0]

    emb_wx = emb_wx_ref[...]
    wzh = wzh_ref[...]
    wrh = wrh_ref[...]
    wmh = wmh_ref[...]
    ids = sent_ref[...]                                            # [Bb, S]

    # Hoisted once (JAX does not CSE broadcast/iota inside loops).
    lane_v = lax.broadcasted_iota(jnp.int32, (Bb, V), 1)

    h = jnp.zeros((Bb, H), _F32)     # loop-carried in vregs
    acc = jnp.zeros((Bb, H), _F32)   # running sum for the temporal mean pool

    # This path is only used when S <= 32 -> fully unroll (static S).
    for t in range(S):
        # Out-of-range ids produce an all-zero row (torch.Embedding would
        # error instead).
        one_hot = jnp.where(lane_v == ids[:, t:t + 1], 1.0, 0.0).astype(_BF16)
        xp = jnp.dot(one_hot, emb_wx, preferred_element_type=_F32)  # [Bb, 3H]
        xz = xp[:, 0:H]           # off-chain lane slices (independent of h)
        xr = xp[:, H:2 * H]
        xm = xp[:, 2 * H:3 * H]
        h, acc = _gru_step(xz, xr, xm, h, acc, wzh, wrh, wmh)

    mean_h = acc * (1.0 / S)       # dropout p=0.2: eval-mode identity (TODO)
    out_ref[...] = _prediction_head(mean_h, w1_ref[...], b1_ref[...],
                                    w2_ref[...], b2_ref[...], out_ref.dtype)


# ---------------------------------------------------------------------------
# Kernel B: large vocab / long seq -- x-projections pre-gathered by XLA and
# streamed as time-major [S, Bb, 3H] tiles (no [V, .] table in VMEM).
# ---------------------------------------------------------------------------
def _gru_stream_kernel(xp_ref,                       # [S, Bb, 3H] bf16
                       wzh_ref, wrh_ref, wmh_ref,    # [H, H] bf16 each
                       w1_ref, b1_ref, w2_ref, b2_ref,
                       out_ref):                     # [Bb, CP] f32
    S, Bb, _ = xp_ref.shape
    H = wzh_ref.shape[0]

    wzh = wzh_ref[...]
    wrh = wrh_ref[...]
    wmh = wmh_ref[...]

    def step(xp_t, h, acc):
        xp = xp_t.astype(_F32)                                     # [Bb, 3H]
        xz = xp[:, 0:H]
        xr = xp[:, H:2 * H]
        xm = xp[:, 2 * H:3 * H]
        return _gru_step(xz, xr, xm, h, acc, wzh, wrh, wmh)

    h = jnp.zeros((Bb, H), _F32)
    acc = jnp.zeros((Bb, H), _F32)

    if S <= 32:
        # Short sequences: full unroll keeps everything in vregs and lets the
        # scheduler overlap the off-chain work under the recurrent chain.
        for t in range(S):
            h, acc = step(xp_ref[t], h, acc)
    else:
        # Long sequences: bounded unroll avoids blowing the 64-vreg file.
        def body(t, carry):
            h_c, acc_c = carry
            return step(xp_ref[t], h_c, acc_c)
        h, acc = lax.fori_loop(0, S, body, (h, acc), unroll=8)

    mean_h = acc * (1.0 / S)       # dropout p=0.2: eval-mode identity (TODO)
    out_ref[...] = _prediction_head(mean_h, w1_ref[...], b1_ref[...],
                                    w2_ref[...], b2_ref[...], out_ref.dtype)


# ---------------------------------------------------------------------------
# Wrapper
# ---------------------------------------------------------------------------
def network_forward(sent, emb_table, params, *, block_b=None,
                    in_kernel_gather=None):
    """sent: [B, S] int ids; emb_table: [V, E]; params: dict of weights."""
    B, S = sent.shape
    V, E = emb_table.shape
    H = params["wzh"].shape[0]
    M = params["w1"].shape[1]
    C = params["w2"].shape[1]

    # ----- one-time weight prep (outside the kernel) -----
    # Fold the embedding table into the input projection:
    #   emb_wx[v] = emb[v] @ [wzx | wrx | wmx]          -> [V, 3H]
    wx_all = jnp.concatenate(
        [params["wzx"], params["wrx"], params["wmx"]], axis=1)      # [E, 3H]
    emb_wx = jnp.dot(emb_table.astype(_F32), wx_all).astype(_BF16)  # [V, 3H]

    wzh = params["wzh"].astype(_BF16)
    wrh = params["wrh"].astype(_BF16)
    wmh = params["wmh"].astype(_BF16)
    w1 = params["w1"].astype(_BF16)
    b1 = params["b1"].astype(_F32).reshape(1, M)

    # Lane-dense output: pad the class dim up to a multiple of 128 lanes.
    CP = ((C + 127) // 128) * 128
    w2p = jnp.zeros((M, CP), _BF16).at[:, :C].set(params["w2"].astype(_BF16))
    b2p = jnp.zeros((1, CP), _F32).at[:, :C].set(
        params["b2"].astype(_F32).reshape(1, C))

    # ----- batch tiling -----
    # >= 2 tiles whenever possible (both v7x TensorCores get work via the
    # "parallel" axis) while keeping tiles as large as possible (<= 128) so
    # single-TC v5e/v6e don't pay per-step pipeline overhead on tiny tiles.
    if block_b is None:
        if B <= 8:
            block_b = B
        else:
            block_b = min(128, ((-(-B // 2)) + 7) // 8 * 8)
    if block_b != B and block_b % 8 != 0:
        block_b = ((block_b + 7) // 8) * 8
    block_b = max(1, min(block_b, B if B <= 8 else max(8, block_b)))

    pad_b = (-B) % block_b
    Bp = B + pad_b
    sent_i32 = sent.astype(jnp.int32)
    if pad_b:
        # Padded rows (token id 0) run through the GRU and are sliced off.
        sent_i32 = jnp.pad(sent_i32, ((0, pad_b), (0, 0)))
    grid = (Bp // block_b,)

    # ----- path selection -----
    if in_kernel_gather is None:
        # Keep the gather in-kernel only when the folded bf16 table is small
        # enough to double-buffer comfortably in VMEM and S can fully unroll;
        # otherwise gather with XLA and stream [S, Bb, 3H] tiles (VMEM-safe on
        # v7x's 64 MiB regardless of vocab size).
        table_bytes = V * 3 * H * 2
        in_kernel_gather = (table_bytes <= (4 << 20)) and (S <= 32)

    # ----- VMEM budget (BlockSpec inputs are double-buffered) -----
    weight_bytes = ((V * 3 * H * 2 if in_kernel_gather else 0)
                    + 3 * H * H * 2 + H * M * 2 + M * 4
                    + M * CP * 2 + CP * 4)
    if in_kernel_gather:
        act_bytes = block_b * S * 4 + block_b * CP * 4
    else:
        act_bytes = S * block_b * 3 * H * 2 + block_b * CP * 4
    est = 2 * (weight_bytes + act_bytes) + (8 << 20)
    vmem_limit = int(min(96 << 20, max(32 << 20, est)))

    cparams = pltpu.CompilerParams(
        dimension_semantics=("parallel",),
        vmem_limit_bytes=vmem_limit)

    weight_specs = [
        pl.BlockSpec((H, H), lambda i: (0, 0)),       # wzh
        pl.BlockSpec((H, H), lambda i: (0, 0)),       # wrh
        pl.BlockSpec((H, H), lambda i: (0, 0)),       # wmh
        pl.BlockSpec((H, M), lambda i: (0, 0)),       # w1
        pl.BlockSpec((1, M), lambda i: (0, 0)),       # b1
        pl.BlockSpec((M, CP), lambda i: (0, 0)),      # w2 (padded)
        pl.BlockSpec((1, CP), lambda i: (0, 0)),      # b2 (padded)
    ]
    out_spec = pl.BlockSpec((block_b, CP), lambda i: (i, 0))
    out_shape = jax.ShapeDtypeStruct((Bp, CP), _F32)

    if in_kernel_gather:
        logits_p = pl.pallas_call(
            _gru_gather_kernel,
            out_shape=out_shape,
            grid=grid,
            in_specs=[pl.BlockSpec((block_b, S), lambda i: (i, 0)),   # sent
                      pl.BlockSpec((V, 3 * H), lambda i: (0, 0)),     # emb_wx
                      ] + weight_specs,
            out_specs=out_spec,
            compiler_params=cparams,
        )(sent_i32, emb_wx, wzh, wrh, wmh, w1, b1, w2p, b2p)
    else:
        # XLA gather of the folded table, laid out time-major so the kernel's
        # per-step access is a cheap leading-dim index.
        xp_all = jnp.take(emb_wx, jnp.transpose(sent_i32), axis=0)  # [S,Bp,3H]
        logits_p = pl.pallas_call(
            _gru_stream_kernel,
            out_shape=out_shape,
            grid=grid,
            in_specs=[pl.BlockSpec((S, block_b, 3 * H), lambda i: (0, i, 0)),
                      ] + weight_specs,
            out_specs=out_spec,
            compiler_params=cparams,
        )(xp_all, wzh, wrh, wmh, w1, b1, w2p, b2p)

    return logits_p[:B, :C]


# ---------------------------------------------------------------------------
# Parameter construction + pure-JAX reference
# ---------------------------------------------------------------------------
def make_params(key, emb_size, rnn_size, mlp_hidden=64, class_num=5):
    ks = jax.random.split(key, 8)
    scale = 0.1
    # GRU gate weights, stored as [in, out] (already transposed vs torch Linear)
    wzx = scale * jax.random.normal(ks[0], (emb_size, rnn_size), _F32)
    wzh = scale * jax.random.normal(ks[1], (rnn_size, rnn_size), _F32)
    wrx = scale * jax.random.normal(ks[2], (emb_size, rnn_size), _F32)
    wrh = scale * jax.random.normal(ks[3], (rnn_size, rnn_size), _F32)
    wmx = scale * jax.random.normal(ks[4], (emb_size, rnn_size), _F32)
    wmh = scale * jax.random.normal(ks[5], (rnn_size, rnn_size), _F32)
    # prediction network
    w1 = scale * jax.random.normal(ks[6], (rnn_size, mlp_hidden), _F32)
    b1 = jnp.full((1, mlp_hidden), 0.01, _F32)
    w2 = scale * jax.random.normal(ks[7], (mlp_hidden, class_num), _F32)
    b2 = jnp.full((1, class_num), -0.02, _F32)
    return dict(wzx=wzx, wzh=wzh, wrx=wrx, wrh=wrh, wmx=wmx, wmh=wmh,
                w1=w1, b1=b1, w2=w2, b2=b2)


def reference_forward(sent, emb_table, params):
    """Pure-JAX f32 reference of the PyTorch forward (mode='GRU', eval dropout)."""
    embedding = jnp.take(emb_table, sent, axis=0)       # [B, S, E]
    emb_tm = jnp.transpose(embedding, (1, 0, 2))        # [S, B, E]
    S, B, _ = emb_tm.shape
    H = params["wzh"].shape[0]
    h = jnp.zeros((B, H), _F32)
    hs = []
    for t in range(S):
        x = emb_tm[t]
        z = jax.nn.sigmoid(x @ params["wzx"] + h @ params["wzh"])
        r = jax.nn.sigmoid(x @ params["wrx"] + h @ params["wrh"])
        h_hat = jnp.tanh(x @ params["wmx"] + (r * h) @ params["wmh"])
        h = (1.0 - z) * h + z * h_hat
        hs.append(h)
    hidden_states = jnp.stack(hs, axis=1)               # [B, S, H]
    rep = hidden_states.mean(axis=1)                    # [B, H]
    hid = jnp.maximum(rep @ params["w1"] + params["b1"], 0.0)
    return hid @ params["w2"] + params["b2"]


if __name__ == "__main__":
    key = jax.random.PRNGKey(0)
    k_emb, k_sent, k_par = jax.random.split(key, 3)

    vocab_size = 50
    emb_size = 32
    rnn_size = 32
    batch = 16
    seq = 8

    emb_table = 0.1 * jax.random.normal(k_emb, (vocab_size, emb_size), _F32)
    sent = jax.random.randint(k_sent, (batch, seq), 0, vocab_size, jnp.int32)
    params = make_params(k_par, emb_size, rnn_size)

    ref = reference_forward(sent, emb_table, params)

    # Path 1: in-kernel one-hot gather of the folded table (small vocab).
    # Auto batch tiling gives 2 tiles -> exercises the parallel grid axis.
    out_a = jax.block_until_ready(network_forward(sent, emb_table, params))
    np.testing.assert_allclose(np.asarray(out_a), np.asarray(ref),
                               rtol=2e-2, atol=1e-2)

    # Path 2: XLA gather + streamed [S, Bb, 3H] tiles (large-vocab / v7x path).
    out_b = jax.block_until_ready(
        network_forward(sent, emb_table, params, in_kernel_gather=False))
    np.testing.assert_allclose(np.asarray(out_b), np.asarray(ref),
                               rtol=2e-2, atol=1e-2)

    print("KERNEL_OK")
</pallas_src>

<mosaic_0001>
module attributes {stable_mosaic.version = 11 : i64} {
  func.func @_gru_gather_kernel(%arg0: i32, %arg1: memref<8x8xi32, #tpu.memory_space<vmem>>, %arg2: memref<50x96xbf16, #tpu.memory_space<vmem>>, %arg3: memref<32x32xbf16, #tpu.memory_space<vmem>>, %arg4: memref<32x32xbf16, #tpu.memory_space<vmem>>, %arg5: memref<32x32xbf16, #tpu.memory_space<vmem>>, %arg6: memref<32x64xbf16, #tpu.memory_space<vmem>>, %arg7: memref<1x64xf32, #tpu.memory_space<vmem>>, %arg8: memref<64x128xbf16, #tpu.memory_space<vmem>>, %arg9: memref<1x128xf32, #tpu.memory_space<vmem>>, %arg10: memref<8x128xf32, #tpu.memory_space<vmem>>) attributes {dimension_semantics = [#tpu.dimension_semantics<parallel>], iteration_bounds = array<i64: 2>, scalar_prefetch = 0 : i64, scratch_operands = 0 : i64, tpu.core_type = #tpu.core_type<tc>, window_params = [{transform_indices = @transform_0, window_bounds = array<i64: 8, 8>}, {pipeline_mode = #tpu.pipeline_mode<synchronous>, transform_indices = @transform_1, window_bounds = array<i64: 50, 96>}, {pipeline_mode = #tpu.pipeline_mode<synchronous>, transform_indices = @transform_2, window_bounds = array<i64: 32, 32>}, {pipeline_mode = #tpu.pipeline_mode<synchronous>, transform_indices = @transform_3, window_bounds = array<i64: 32, 32>}, {pipeline_mode = #tpu.pipeline_mode<synchronous>, transform_indices = @transform_4, window_bounds = array<i64: 32, 32>}, {pipeline_mode = #tpu.pipeline_mode<synchronous>, transform_indices = @transform_5, window_bounds = array<i64: 32, 64>}, {pipeline_mode = #tpu.pipeline_mode<synchronous>, transform_indices = @transform_6, window_bounds = array<i64: 1, 64>}, {pipeline_mode = #tpu.pipeline_mode<synchronous>, transform_indices = @transform_7, window_bounds = array<i64: 64, 128>}, {pipeline_mode = #tpu.pipeline_mode<synchronous>, transform_indices = @transform_8, window_bounds = array<i64: 1, 128>}, {transform_indices = @transform_9, window_bounds = array<i64: 8, 128>}]} {
    %c0 = arith.constant 0 : index
    %c0_0 = arith.constant 0 : index
    %0 = vector.load %arg2[%c0, %c0_0] : memref<50x96xbf16, #tpu.memory_space<vmem>>, vector<50x96xbf16>
    %c0_1 = arith.constant 0 : index
    %c0_2 = arith.constant 0 : index
    %1 = vector.load %arg3[%c0_1, %c0_2] : memref<32x32xbf16, #tpu.memory_space<vmem>>, vector<32x32xbf16>
    %c0_3 = arith.constant 0 : index
    %c0_4 = arith.constant 0 : index
    %2 = vector.load %arg4[%c0_3, %c0_4] : memref<32x32xbf16, #tpu.memory_space<vmem>>, vector<32x32xbf16>
    %c0_5 = arith.constant 0 : index
    %c0_6 = arith.constant 0 : index
    %3 = vector.load %arg5[%c0_5, %c0_6] : memref<32x32xbf16, #tpu.memory_space<vmem>>, vector<32x32xbf16>
    %c0_7 = arith.constant 0 : index
    %c0_8 = arith.constant 0 : index
    %4 = vector.load %arg1[%c0_7, %c0_8] : memref<8x8xi32, #tpu.memory_space<vmem>>, vector<8x8xi32>
    %5 = tpu.iota {dimensions = array<i32: 1>} : vector<8x50xi32>
    %cst = arith.constant 0.000000e+00 : f32
    %6 = vector.broadcast %cst : f32 to vector<8x32xf32>
    %cst_9 = arith.constant 0.000000e+00 : f32
    %7 = vector.broadcast %cst_9 : f32 to vector<8x32xf32>
    %8 = vector.extract_strided_slice %4 {offsets = [0, 0], sizes = [8, 1], strides = [1, 1]} : vector<8x8xi32> to vector<8x1xi32>
    %9 = vector.broadcast %8 : vector<8x1xi32> to vector<8x50xi32>
    %10 = arith.cmpi eq, %5, %9 : vector<8x50xi32>
    %cst_10 = arith.constant 1.000000e+00 : f32
    %cst_11 = arith.constant 0.000000e+00 : f32
    %11 = vector.broadcast %cst_10 : f32 to vector<8x50xf32>
    %12 = vector.broadcast %cst_11 : f32 to vector<8x50xf32>
    %13 = arith.select %10, %11, %12 : vector<8x50xi1>, vector<8x50xf32>
    %14 = arith.truncf %13 : vector<8x50xf32> to vector<8x50xbf16>
    %cst_12 = arith.constant dense<0.000000e+00> : vector<8x96xf32>
    %15 = tpu.matmul %14, %0, %cst_12 {dimension_numbers = #tpu.dot_dimension_numbers<[1], [0], [0], [1], [0, 0, 1, 1], [], []>} : vector<8x50xbf16>, vector<50x96xbf16>, vector<8x96xf32> -> vector<8x96xf32>
    %16 = vector.extract_strided_slice %15 {offsets = [0, 0], sizes = [8, 32], strides = [1, 1]} : vector<8x96xf32> to vector<8x32xf32>
    %17 = vector.extract_strided_slice %15 {offsets = [0, 32], sizes = [8, 32], strides = [1, 1]} : vector<8x96xf32> to vector<8x32xf32>
    %18 = vector.extract_strided_slice %15 {offsets = [0, 64], sizes = [8, 32], strides = [1, 1]} : vector<8x96xf32> to vector<8x32xf32>
    %19 = arith.truncf %6 : vector<8x32xf32> to vector<8x32xbf16>
    %cst_13 = arith.constant dense<0.000000e+00> : vector<8x32xf32>
    %20 = tpu.matmul %19, %1, %cst_13 {dimension_numbers = #tpu.dot_dimension_numbers<[1], [0], [0], [1], [0, 0, 1, 1], [], []>} : vector<8x32xbf16>, vector<32x32xbf16>, vector<8x32xf32> -> vector<8x32xf32>
    %cst_14 = arith.constant dense<0.000000e+00> : vector<8x32xf32>
    %21 = tpu.matmul %19, %2, %cst_14 {dimension_numbers = #tpu.dot_dimension_numbers<[1], [0], [0], [1], [0, 0, 1, 1], [], []>} : vector<8x32xbf16>, vector<32x32xbf16>, vector<8x32xf32> -> vector<8x32xf32>
    %22 = arith.addf %16, %20 : vector<8x32xf32>
    %23 = arith.negf %22 : vector<8x32xf32>
    %24 = math.exp %23 : vector<8x32xf32>
    %cst_15 = arith.constant 1.000000e+00 : f32
    %25 = vector.broadcast %cst_15 : f32 to vector<8x32xf32>
    %26 = arith.addf %25, %24 : vector<8x32xf32>
    %27 = arith.divf %25, %26 : vector<8x32xf32>
    %28 = arith.addf %17, %21 : vector<8x32xf32>
    %29 = arith.negf %28 : vector<8x32xf32>
    %30 = math.exp %29 : vector<8x32xf32>
    %cst_16 = arith.constant 1.000000e+00 : f32
    %31 = vector.broadcast %cst_16 : f32 to vector<8x32xf32>
    %32 = arith.addf %31, %30 : vector<8x32xf32>
    %33 = arith.divf %31, %32 : vector<8x32xf32>
    %34 = arith.mulf %33, %6 : vector<8x32xf32>
    %35 = arith.truncf %34 : vector<8x32xf32> to vector<8x32xbf16>
    %cst_17 = arith.constant dense<0.000000e+00> : vector<8x32xf32>
    %36 = tpu.matmul %35, %3, %cst_17 {dimension_numbers = #tpu.dot_dimension_numbers<[1], [0], [0], [1], [0, 0, 1, 1], [], []>} : vector<8x32xbf16>, vector<32x32xbf16>, vector<8x32xf32> -> vector<8x32xf32>
    %37 = arith.addf %18, %36 : vector<8x32xf32>
    %38 = math.tanh %37 : vector<8x32xf32>
    %39 = arith.subf %38, %6 : vector<8x32xf32>
    %40 = arith.mulf %27, %39 : vector<8x32xf32>
    %41 = arith.addf %6, %40 : vector<8x32xf32>
    %42 = arith.addf %7, %41 : vector<8x32xf32>
    %43 = vector.extract_strided_slice %4 {offsets = [0, 1], sizes = [8, 1], strides = [1, 1]} : vector<8x8xi32> to vector<8x1xi32>
    %44 = vector.broadcast %43 : vector<8x1xi32> to vector<8x50xi32>
    %45 = arith.cmpi eq, %5, %44 : vector<8x50xi32>
    %cst_18 = arith.constant 1.000000e+00 : f32
    %cst_19 = arith.constant 0.000000e+00 : f32
    %46 = vector.broadcast %cst_18 : f32 to vector<8x50xf32>
    %47 = vector.broadcast %cst_19 : f32 to vector<8x50xf32>
    %48 = arith.select %45, %46, %47 : vector<8x50xi1>, vector<8x50xf32>
    %49 = arith.truncf %48 : vector<8x50xf32> to vector<8x50xbf16>
    %cst_20 = arith.constant dense<0.000000e+00> : vector<8x96xf32>
    %50 = tpu.matmul %49, %0, %cst_20 {dimension_numbers = #tpu.dot_dimension_numbers<[1], [0], [0], [1], [0, 0, 1, 1], [], []>} : vector<8x50xbf16>, vector<50x96xbf16>, vector<8x96xf32> -> vector<8x96xf32>
    %51 = vector.extract_strided_slice %50 {offsets = [0, 0], sizes = [8, 32], strides = [1, 1]} : vector<8x96xf32> to vector<8x32xf32>
    %52 = vector.extract_strided_slice %50 {offsets = [0, 32], sizes = [8, 32], strides = [1, 1]} : vector<8x96xf32> to vector<8x32xf32>
    %53 = vector.extract_strided_slice %50 {offsets = [0, 64], sizes = [8, 32], strides = [1, 1]} : vector<8x96xf32> to vector<8x32xf32>
    %54 = arith.truncf %41 : vector<8x32xf32> to vector<8x32xbf16>
    %cst_21 = arith.constant dense<0.000000e+00> : vector<8x32xf32>
    %55 = tpu.matmul %54, %1, %cst_21 {dimension_numbers = #tpu.dot_dimension_numbers<[1], [0], [0], [1], [0, 0, 1, 1], [], []>} : vector<8x32xbf16>, vector<32x32xbf16>, vector<8x32xf32> -> vector<8x32xf32>
    %cst_22 = arith.constant dense<0.000000e+00> : vector<8x32xf32>
    %56 = tpu.matmul %54, %2, %cst_22 {dimension_numbers = #tpu.dot_dimension_numbers<[1], [0], [0], [1], [0, 0, 1, 1], [], []>} : vector<8x32xbf16>, vector<32x32xbf16>, vector<8x32xf32> -> vector<8x32xf32>
    %57 = arith.addf %51, %55 : vector<8x32xf32>
    %58 = arith.negf %57 : vector<8x32xf32>
    %59 = math.exp %58 : vector<8x32xf32>
    %cst_23 = arith.constant 1.000000e+00 : f32
    %60 = vector.broadcast %cst_23 : f32 to vector<8x32xf32>
    %61 = arith.addf %60, %59 : vector<8x32xf32>
    %62 = arith.divf %60, %61 : vector<8x32xf32>
    %63 = arith.addf %52, %56 : vector<8x32xf32>
    %64 = arith.negf %63 : vector<8x32xf32>
    %65 = math.exp %64 : vector<8x32xf32>
    %cst_24 = arith.constant 1.000000e+00 : f32
    %66 = vector.broadcast %cst_24 : f32 to vector<8x32xf32>
    %67 = arith.addf %66, %65 : vector<8x32xf32>
    %68 = arith.divf %66, %67 : vector<8x32xf32>
    %69 = arith.mulf %68, %41 : vector<8x32xf32>
    %70 = arith.truncf %69 : vector<8x32xf32> to vector<8x32xbf16>
    %cst_25 = arith.constant dense<0.000000e+00> : vector<8x32xf32>
    %71 = tpu.matmul %70, %3, %cst_25 {dimension_numbers = #tpu.dot_dimension_numbers<[1], [0], [0], [1], [0, 0, 1, 1], [], []>} : vector<8x32xbf16>, vector<32x32xbf16>, vector<8x32xf32> -> vector<8x32xf32>
    %72 = arith.addf %53, %71 : vector<8x32xf32>
    %73 = math.tanh %72 : vector<8x32xf32>
    %74 = arith.subf %73, %41 : vector<8x32xf32>
    %75 = arith.mulf %62, %74 : vector<8x32xf32>
    %76 = arith.addf %41, %75 : vector<8x32xf32>
    %77 = arith.addf %42, %76 : vector<8x32xf32>
    %78 = vector.extract_strided_slice %4 {offsets = [0, 2], sizes = [8, 1], strides = [1, 1]} : vector<8x8xi32> to vector<8x1xi32>
    %79 = vector.broadcast %78 : vector<8x1xi32> to vector<8x50xi32>
    %80 = arith.cmpi eq, %5, %79 : vector<8x50xi32>
    %cst_26 = arith.constant 1.000000e+00 : f32
    %cst_27 = arith.constant 0.000000e+00 : f32
    %81 = vector.broadcast %cst_26 : f32 to vector<8x50xf32>
    %82 = vector.broadcast %cst_27 : f32 to vector<8x50xf32>
    %83 = arith.select %80, %81, %82 : vector<8x50xi1>, vector<8x50xf32>
    %84 = arith.truncf %83 : vector<8x50xf32> to vector<8x50xbf16>
    %cst_28 = arith.constant dense<0.000000e+00> : vector<8x96xf32>
    %85 = tpu.matmul %84, %0, %cst_28 {dimension_numbers = #tpu.dot_dimension_numbers<[1], [0], [0], [1], [0, 0, 1, 1], [], []>} : vector<8x50xbf16>, vector<50x96xbf16>, vector<8x96xf32> -> vector<8x96xf32>
    %86 = vector.extract_strided_slice %85 {offsets = [0, 0], sizes = [8, 32], strides = [1, 1]} : vector<8x96xf32> to vector<8x32xf32>
    %87 = vector.extract_strided_slice %85 {offsets = [0, 32], sizes = [8, 32], strides = [1, 1]} : vector<8x96xf32> to vector<8x32xf32>
    %88 = vector.extract_strided_slice %85 {offsets = [0, 64], sizes = [8, 32], strides = [1, 1]} : vector<8x96xf32> to vector<8x32xf32>
    %89 = arith.truncf %76 : vector<8x32xf32> to vector<8x32xbf16>
    %cst_29 = arith.constant dense<0.000000e+00> : vector<8x32xf32>
    %90 = tpu.matmul %89, %1, %cst_29 {dimension_numbers = #tpu.dot_dimension_numbers<[1], [0], [0], [1], [0, 0, 1, 1], [], []>} : vector<8x32xbf16>, vector<32x32xbf16>, vector<8x32xf32> -> vector<8x32xf32>
    %cst_30 = arith.constant dense<0.000000e+00> : vector<8x32xf32>
    %91 = tpu.matmul %89, %2, %cst_30 {dimension_numbers = #tpu.dot_dimension_numbers<[1], [0], [0], [1], [0, 0, 1, 1], [], []>} : vector<8x32xbf16>, vector<32x32xbf16>, vector<8x32xf32> -> vector<8x32xf32>
    %92 = arith.addf %86, %90 : vector<8x32xf32>
    %93 = arith.negf %92 : vector<8x32xf32>
    %94 = math.exp %93 : vector<8x32xf32>
    %cst_31 = arith.constant 1.000000e+00 : f32
    %95 = vector.broadcast %cst_31 : f32 to vector<8x32xf32>
    %96 = arith.addf %95, %94 : vector<8x32xf32>
    %97 = arith.divf %95, %96 : vector<8x32xf32>
    %98 = arith.addf %87, %91 : vector<8x32xf32>
    %99 = arith.negf %98 : vector<8x32xf32>
    %100 = math.exp %99 : vector<8x32xf32>
    %cst_32 = arith.constant 1.000000e+00 : f32
    %101 = vector.broadcast %cst_32 : f32 to vector<8x32xf32>
    %102 = arith.addf %101, %100 : vector<8x32xf32>
    %103 = arith.divf %101, %102 : vector<8x32xf32>
    %104 = arith.mulf %103, %76 : vector<8x32xf32>
    %105 = arith.truncf %104 : vector<8x32xf32> to vector<8x32xbf16>
    %cst_33 = arith.constant dense<0.000000e+00> : vector<8x32xf32>
    %106 = tpu.matmul %105, %3, %cst_33 {dimension_numbers = #tpu.dot_dimension_numbers<[1], [0], [0], [1], [0, 0, 1, 1], [], []>} : vector<8x32xbf16>, vector<32x32xbf16>, vector<8x32xf32> -> vector<8x32xf32>
    %107 = arith.addf %88, %106 : vector<8x32xf32>
    %108 = math.tanh %107 : vector<8x32xf32>
    %109 = arith.subf %108, %76 : vector<8x32xf32>
    %110 = arith.mulf %97, %109 : vector<8x32xf32>
    %111 = arith.addf %76, %110 : vector<8x32xf32>
    %112 = arith.addf %77, %111 : vector<8x32xf32>
    %113 = vector.extract_strided_slice %4 {offsets = [0, 3], sizes = [8, 1], strides = [1, 1]} : vector<8x8xi32> to vector<8x1xi32>
    %114 = vector.broadcast %113 : vector<8x1xi32> to vector<8x50xi32>
    %115 = arith.cmpi eq, %5, %114 : vector<8x50xi32>
    %cst_34 = arith.constant 1.000000e+00 : f32
    %cst_35 = arith.constant 0.000000e+00 : f32
    %116 = vector.broadcast %cst_34 : f32 to vector<8x50xf32>
    %117 = vector.broadcast %cst_35 : f32 to vector<8x50xf32>
    %118 = arith.select %115, %116, %117 : vector<8x50xi1>, vector<8x50xf32>
    %119 = arith.truncf %118 : vector<8x50xf32> to vector<8x50xbf16>
    %cst_36 = arith.constant dense<0.000000e+00> : vector<8x96xf32>
    %120 = tpu.matmul %119, %0, %cst_36 {dimension_numbers = #tpu.dot_dimension_numbers<[1], [0], [0], [1], [0, 0, 1, 1], [], []>} : vector<8x50xbf16>, vector<50x96xbf16>, vector<8x96xf32> -> vector<8x96xf32>
    %121 = vector.extract_strided_slice %120 {offsets = [0, 0], sizes = [8, 32], strides = [1, 1]} : vector<8x96xf32> to vector<8x32xf32>
    %122 = vector.extract_strided_slice %120 {offsets = [0, 32], sizes = [8, 32], strides = [1, 1]} : vector<8x96xf32> to vector<8x32xf32>
    %123 = vector.extract_strided_slice %120 {offsets = [0, 64], sizes = [8, 32], strides = [1, 1]} : vector<8x96xf32> to vector<8x32xf32>
    %124 = arith.truncf %111 : vector<8x32xf32> to vector<8x32xbf16>
    %cst_37 = arith.constant dense<0.000000e+00> : vector<8x32xf32>
    %125 = tpu.matmul %124, %1, %cst_37 {dimension_numbers = #tpu.dot_dimension_numbers<[1], [0], [0], [1], [0, 0, 1, 1], [], []>} : vector<8x32xbf16>, vector<32x32xbf16>, vector<8x32xf32> -> vector<8x32xf32>
    %cst_38 = arith.constant dense<0.000000e+00> : vector<8x32xf32>
    %126 = tpu.matmul %124, %2, %cst_38 {dimension_numbers = #tpu.dot_dimension_numbers<[1], [0], [0], [1], [0, 0, 1, 1], [], []>} : vector<8x32xbf16>, vector<32x32xbf16>, vector<8x32xf32> -> vector<8x32xf32>
    %127 = arith.addf %121, %125 : vector<8x32xf32>
    %128 = arith.negf %127 : vector<8x32xf32>
    %129 = math.exp %128 : vector<8x32xf32>
    %cst_39 = arith.constant 1.000000e+00 : f32
    %130 = vector.broadcast %cst_39 : f32 to vector<8x32xf32>
    %131 = arith.addf %130, %129 : vector<8x32xf32>
    %132 = arith.divf %130, %131 : vector<8x32xf32>
    %133 = arith.addf %122, %126 : vector<8x32xf32>
    %134 = arith.negf %133 : vector<8x32xf32>
    %135 = math.exp %134 : vector<8x32xf32>
    %cst_40 = arith.constant 1.000000e+00 : f32
    %136 = vector.broadcast %cst_40 : f32 to vector<8x32xf32>
    %137 = arith.addf %136, %135 : vector<8x32xf32>
    %138 = arith.divf %136, %137 : vector<8x32xf32>
    %139 = arith.mulf %138, %111 : vector<8x32xf32>
    %140 = arith.truncf %139 : vector<8x32xf32> to vector<8x32xbf16>
    %cst_41 = arith.constant dense<0.000000e+00> : vector<8x32xf32>
    %141 = tpu.matmul %140, %3, %cst_41 {dimension_numbers = #tpu.dot_dimension_numbers<[1], [0], [0], [1], [0, 0, 1, 1], [], []>} : vector<8x32xbf16>, vector<32x32xbf16>, vector<8x32xf32> -> vector<8x32xf32>
    %142 = arith.addf %123, %141 : vector<8x32xf32>
    %143 = math.tanh %142 : vector<8x32xf32>
    %144 = arith.subf %143, %111 : vector<8x32xf32>
    %145 = arith.mulf %132, %144 : vector<8x32xf32>
    %146 = arith.addf %111, %145 : vector<8x32xf32>
    %147 = arith.addf %112, %146 : vector<8x32xf32>
    %148 = vector.extract_strided_slice %4 {offsets = [0, 4], sizes = [8, 1], strides = [1, 1]} : vector<8x8xi32> to vector<8x1xi32>
    %149 = vector.broadcast %148 : vector<8x1xi32> to vector<8x50xi32>
    %150 = arith.cmpi eq, %5, %149 : vector<8x50xi32>
    %cst_42 = arith.constant 1.000000e+00 : f32
    %cst_43 = arith.constant 0.000000e+00 : f32
    %151 = vector.broadcast %cst_42 : f32 to vector<8x50xf32>
    %152 = vector.broadcast %cst_43 : f32 to vector<8x50xf32>
    %153 = arith.select %150, %151, %152 : vector<8x50xi1>, vector<8x50xf32>
    %154 = arith.truncf %153 : vector<8x50xf32> to vector<8x50xbf16>
    %cst_44 = arith.constant dense<0.000000e+00> : vector<8x96xf32>
    %155 = tpu.matmul %154, %0, %cst_44 {dimension_numbers = #tpu.dot_dimension_numbers<[1], [0], [0], [1], [0, 0, 1, 1], [], []>} : vector<8x50xbf16>, vector<50x96xbf16>, vector<8x96xf32> -> vector<8x96xf32>
    %156 = vector.extract_strided_slice %155 {offsets = [0, 0], sizes = [8, 32], strides = [1, 1]} : vector<8x96xf32> to vector<8x32xf32>
    %157 = vector.extract_strided_slice %155 {offsets = [0, 32], sizes = [8, 32], strides = [1, 1]} : vector<8x96xf32> to vector<8x32xf32>
    %158 = vector.extract_strided_slice %155 {offsets = [0, 64], sizes = [8, 32], strides = [1, 1]} : vector<8x96xf32> to vector<8x32xf32>
    %159 = arith.truncf %146 : vector<8x32xf32> to vector<8x32xbf16>
    %cst_45 = arith.constant dense<0.000000e+00> : vector<8x32xf32>
    %160 = tpu.matmul %159, %1, %cst_45 {dimension_numbers = #tpu.dot_dimension_numbers<[1], [0], [0], [1], [0, 0, 1, 1], [], []>} : vector<8x32xbf16>, vector<32x32xbf16>, vector<8x32xf32> -> vector<8x32xf32>
    %cst_46 = arith.constant dense<0.000000e+00> : vector<8x32xf32>
    %161 = tpu.matmul %159, %2, %cst_46 {dimension_numbers = #tpu.dot_dimension_numbers<[1], [0], [0], [1], [0, 0, 1, 1], [], []>} : vector<8x32xbf16>, vector<32x32xbf16>, vector<8x32xf32> -> vector<8x32xf32>
    %162 = arith.addf %156, %160 : vector<8x32xf32>
    %163 = arith.negf %162 : vector<8x32xf32>
    %164 = math.exp %163 : vector<8x32xf32>
    %cst_47 = arith.constant 1.000000e+00 : f32
    %165 = vector.broadcast %cst_47 : f32 to vector<8x32xf32>
    %166 = arith.addf %165, %164 : vector<8x32xf32>
    %167 = arith.divf %165, %166 : vector<8x32xf32>
    %168 = arith.addf %157, %161 : vector<8x32xf32>
    %169 = arith.negf %168 : vector<8x32xf32>
    %170 = math.exp %169 : vector<8x32xf32>
    %cst_48 = arith.constant 1.000000e+00 : f32
    %171 = vector.broadcast %cst_48 : f32 to vector<8x32xf32>
    %172 = arith.addf %171, %170 : vector<8x32xf32>
    %173 = arith.divf %171, %172 : vector<8x32xf32>
    %174 = arith.mulf %173, %146 : vector<8x32xf32>
    %175 = arith.truncf %174 : vector<8x32xf32> to vector<8x32xbf16>
    %cst_49 = arith.constant dense<0.000000e+00> : vector<8x32xf32>
    %176 = tpu.matmul %175, %3, %cst_49 {dimension_numbers = #tpu.dot_dimension_numbers<[1], [0], [0], [1], [0, 0, 1, 1], [], []>} : vector<8x32xbf16>, vector<32x32xbf16>, vector<8x32xf32> -> vector<8x32xf32>
    %177 = arith.addf %158, %176 : vector<8x32xf32>
    %178 = math.tanh %177 : vector<8x32xf32>
    %179 = arith.subf %178, %146 : vector<8x32xf32>
    %180 = arith.mulf %167, %179 : vector<8x32xf32>
    %181 = arith.addf %146, %180 : vector<8x32xf32>
    %182 = arith.addf %147, %181 : vector<8x32xf32>
    %183 = vector.extract_strided_slice %4 {offsets = [0, 5], sizes = [8, 1], strides = [1, 1]} : vector<8x8xi32> to vector<8x1xi32>
    %184 = vector.broadcast %183 : vector<8x1xi32> to vector<8x50xi32>
    %185 = arith.cmpi eq, %5, %184 : vector<8x50xi32>
    %cst_50 = arith.constant 1.000000e+00 : f32
    %cst_51 = arith.constant 0.000000e+00 : f32
    %186 = vector.broadcast %cst_50 : f32 to vector<8x50xf32>
    %187 = vector.broadcast %cst_51 : f32 to vector<8x50xf32>
    %188 = arith.select %185, %186, %187 : vector<8x50xi1>, vector<8x50xf32>
    %189 = arith.truncf %188 : vector<8x50xf32> to vector<8x50xbf16>
    %cst_52 = arith.constant dense<0.000000e+00> : vector<8x96xf32>
    %190 = tpu.matmul %189, %0, %cst_52 {dimension_numbers = #tpu.dot_dimension_numbers<[1], [0], [0], [1], [0, 0, 1, 1], [], []>} : vector<8x50xbf16>, vector<50x96xbf16>, vector<8x96xf32> -> vector<8x96xf32>
    %191 = vector.extract_strided_slice %190 {offsets = [0, 0], sizes = [8, 32], strides = [1, 1]} : vector<8x96xf32> to vector<8x32xf32>
    %192 = vector.extract_strided_slice %190 {offsets = [0, 32], sizes = [8, 32], strides = [1, 1]} : vector<8x96xf32> to vector<8x32xf32>
    %193 = vector.extract_strided_slice %190 {offsets = [0, 64], sizes = [8, 32], strides = [1, 1]} : vector<8x96xf32> to vector<8x32xf32>
    %194 = arith.truncf %181 : vector<8x32xf32> to vector<8x32xbf16>
    %cst_53 = arith.constant dense<0.000000e+00> : vector<8x32xf32>
    %195 = tpu.matmul %194, %1, %cst_53 {dimension_numbers = #tpu.dot_dimension_numbers<[1], [0], [0], [1], [0, 0, 1, 1], [], []>} : vector<8x32xbf16>, vector<32x32xbf16>, vector<8x32xf32> -> vector<8x32xf32>
    %cst_54 = arith.constant dense<0.000000e+00> : vector<8x32xf32>
    %196 = tpu.matmul %194, %2, %cst_54 {dimension_numbers = #tpu.dot_dimension_numbers<[1], [0], [0], [1], [0, 0, 1, 1], [], []>} : vector<8x32xbf16>, vector<32x32xbf16>, vector<8x32xf32> -> vector<8x32xf32>
    %197 = arith.addf %191, %195 : vector<8x32xf32>
    %198 = arith.negf %197 : vector<8x32xf32>
    %199 = math.exp %198 : vector<8x32xf32>
    %cst_55 = arith.constant 1.000000e+00 : f32
    %200 = vector.broadcast %cst_55 : f32 to vector<8x32xf32>
    %201 = arith.addf %200, %199 : vector<8x32xf32>
    %202 = arith.divf %200, %201 : vector<8x32xf32>
    %203 = arith.addf %192, %196 : vector<8x32xf32>
    %204 = arith.negf %203 : vector<8x32xf32>
    %205 = math.exp %204 : vector<8x32xf32>
    %cst_56 = arith.constant 1.000000e+00 : f32
    %206 = vector.broadcast %cst_56 : f32 to vector<8x32xf32>
    %207 = arith.addf %206, %205 : vector<8x32xf32>
    %208 = arith.divf %206, %207 : vector<8x32xf32>
    %209 = arith.mulf %208, %181 : vector<8x32xf32>
    %210 = arith.truncf %209 : vector<8x32xf32> to vector<8x32xbf16>
    %cst_57 = arith.constant dense<0.000000e+00> : vector<8x32xf32>
    %211 = tpu.matmul %210, %3, %cst_57 {dimension_numbers = #tpu.dot_dimension_numbers<[1], [0], [0], [1], [0, 0, 1, 1], [], []>} : vector<8x32xbf16>, vector<32x32xbf16>, vector<8x32xf32> -> vector<8x32xf32>
    %212 = arith.addf %193, %211 : vector<8x32xf32>
    %213 = math.tanh %212 : vector<8x32xf32>
    %214 = arith.subf %213, %181 : vector<8x32xf32>
    %215 = arith.mulf %202, %214 : vector<8x32xf32>
    %216 = arith.addf %181, %215 : vector<8x32xf32>
    %217 = arith.addf %182, %216 : vector<8x32xf32>
    %218 = vector.extract_strided_slice %4 {offsets = [0, 6], sizes = [8, 1], strides = [1, 1]} : vector<8x8xi32> to vector<8x1xi32>
    %219 = vector.broadcast %218 : vector<8x1xi32> to vector<8x50xi32>
    %220 = arith.cmpi eq, %5, %219 : vector<8x50xi32>
    %cst_58 = arith.constant 1.000000e+00 : f32
    %cst_59 = arith.constant 0.000000e+00 : f32
    %221 = vector.broadcast %cst_58 : f32 to vector<8x50xf32>
    %222 = vector.broadcast %cst_59 : f32 to vector<8x50xf32>
    %223 = arith.select %220, %221, %222 : vector<8x50xi1>, vector<8x50xf32>
    %224 = arith.truncf %223 : vector<8x50xf32> to vector<8x50xbf16>
    %cst_60 = arith.constant dense<0.000000e+00> : vector<8x96xf32>
    %225 = tpu.matmul %224, %0, %cst_60 {dimension_numbers = #tpu.dot_dimension_numbers<[1], [0], [0], [1], [0, 0, 1, 1], [], []>} : vector<8x50xbf16>, vector<50x96xbf16>, vector<8x96xf32> -> vector<8x96xf32>
    %226 = vector.extract_strided_slice %225 {offsets = [0, 0], sizes = [8, 32], strides = [1, 1]} : vector<8x96xf32> to vector<8x32xf32>
    %227 = vector.extract_strided_slice %225 {offsets = [0, 32], sizes = [8, 32], strides = [1, 1]} : vector<8x96xf32> to vector<8x32xf32>
    %228 = vector.extract_strided_slice %225 {offsets = [0, 64], sizes = [8, 32], strides = [1, 1]} : vector<8x96xf32> to vector<8x32xf32>
    %229 = arith.truncf %216 : vector<8x32xf32> to vector<8x32xbf16>
    %cst_61 = arith.constant dense<0.000000e+00> : vector<8x32xf32>
    %230 = tpu.matmul %229, %1, %cst_61 {dimension_numbers = #tpu.dot_dimension_numbers<[1], [0], [0], [1], [0, 0, 1, 1], [], []>} : vector<8x32xbf16>, vector<32x32xbf16>, vector<8x32xf32> -> vector<8x32xf32>
    %cst_62 = arith.constant dense<0.000000e+00> : vector<8x32xf32>
    %231 = tpu.matmul %229, %2, %cst_62 {dimension_numbers = #tpu.dot_dimension_numbers<[1], [0], [0], [1], [0, 0, 1, 1], [], []>} : vector<8x32xbf16>, vector<32x32xbf16>, vector<8x32xf32> -> vector<8x32xf32>
    %232 = arith.addf %226, %230 : vector<8x32xf32>
    %233 = arith.negf %232 : vector<8x32xf32>
    %234 = math.exp %233 : vector<8x32xf32>
    %cst_63 = arith.constant 1.000000e+00 : f32
    %235 = vector.broadcast %cst_63 : f32 to vector<8x32xf32>
    %236 = arith.addf %235, %234 : vector<8x32xf32>
    %237 = arith.divf %235, %236 : vector<8x32xf32>
    %238 = arith.addf %227, %231 : vector<8x32xf32>
    %239 = arith.negf %238 : vector<8x32xf32>
    %240 = math.exp %239 : vector<8x32xf32>
    %cst_64 = arith.constant 1.000000e+00 : f32
    %241 = vector.broadcast %cst_64 : f32 to vector<8x32xf32>
    %242 = arith.addf %241, %240 : vector<8x32xf32>
    %243 = arith.divf %241, %242 : vector<8x32xf32>
    %244 = arith.mulf %243, %216 : vector<8x32xf32>
    %245 = arith.truncf %244 : vector<8x32xf32> to vector<8x32xbf16>
    %cst_65 = arith.constant dense<0.000000e+00> : vector<8x32xf32>
    %246 = tpu.matmul %245, %3, %cst_65 {dimension_numbers = #tpu.dot_dimension_numbers<[1], [0], [0], [1], [0, 0, 1, 1], [], []>} : vector<8x32xbf16>, vector<32x32xbf16>, vector<8x32xf32> -> vector<8x32xf32>
    %247 = arith.addf %228, %246 : vector<8x32xf32>
    %248 = math.tanh %247 : vector<8x32xf32>
    %249 = arith.subf %248, %216 : vector<8x32xf32>
    %250 = arith.mulf %237, %249 : vector<8x32xf32>
    %251 = arith.addf %216, %250 : vector<8x32xf32>
    %252 = arith.addf %217, %251 : vector<8x32xf32>
    %253 = vector.extract_strided_slice %4 {offsets = [0, 7], sizes = [8, 1], strides = [1, 1]} : vector<8x8xi32> to vector<8x1xi32>
    %254 = vector.broadcast %253 : vector<8x1xi32> to vector<8x50xi32>
    %255 = arith.cmpi eq, %5, %254 : vector<8x50xi32>
    %cst_66 = arith.constant 1.000000e+00 : f32
    %cst_67 = arith.constant 0.000000e+00 : f32
    %256 = vector.broadcast %cst_66 : f32 to vector<8x50xf32>
    %257 = vector.broadcast %cst_67 : f32 to vector<8x50xf32>
    %258 = arith.select %255, %256, %257 : vector<8x50xi1>, vector<8x50xf32>
    %259 = arith.truncf %258 : vector<8x50xf32> to vector<8x50xbf16>
    %cst_68 = arith.constant dense<0.000000e+00> : vector<8x96xf32>
    %260 = tpu.matmul %259, %0, %cst_68 {dimension_numbers = #tpu.dot_dimension_numbers<[1], [0], [0], [1], [0, 0, 1, 1], [], []>} : vector<8x50xbf16>, vector<50x96xbf16>, vector<8x96xf32> -> vector<8x96xf32>
    %261 = vector.extract_strided_slice %260 {offsets = [0, 0], sizes = [8, 32], strides = [1, 1]} : vector<8x96xf32> to vector<8x32xf32>
    %262 = vector.extract_strided_slice %260 {offsets = [0, 32], sizes = [8, 32], strides = [1, 1]} : vector<8x96xf32> to vector<8x32xf32>
    %263 = vector.extract_strided_slice %260 {offsets = [0, 64], sizes = [8, 32], strides = [1, 1]} : vector<8x96xf32> to vector<8x32xf32>
    %264 = arith.truncf %251 : vector<8x32xf32> to vector<8x32xbf16>
    %cst_69 = arith.constant dense<0.000000e+00> : vector<8x32xf32>
    %265 = tpu.matmul %264, %1, %cst_69 {dimension_numbers = #tpu.dot_dimension_numbers<[1], [0], [0], [1], [0, 0, 1, 1], [], []>} : vector<8x32xbf16>, vector<32x32xbf16>, vector<8x32xf32> -> vector<8x32xf32>
    %cst_70 = arith.constant dense<0.000000e+00> : vector<8x32xf32>
    %266 = tpu.matmul %264, %2, %cst_70 {dimension_numbers = #tpu.dot_dimension_numbers<[1], [0], [0], [1], [0, 0, 1, 1], [], []>} : vector<8x32xbf16>, vector<32x32xbf16>, vector<8x32xf32> -> vector<8x32xf32>
    %267 = arith.addf %261, %265 : vector<8x32xf32>
    %268 = arith.negf %267 : vector<8x32xf32>
    %269 = math.exp %268 : vector<8x32xf32>
    %cst_71 = arith.constant 1.000000e+00 : f32
    %270 = vector.broadcast %cst_71 : f32 to vector<8x32xf32>
    %271 = arith.addf %270, %269 : vector<8x32xf32>
    %272 = arith.divf %270, %271 : vector<8x32xf32>
    %273 = arith.addf %262, %266 : vector<8x32xf32>
    %274 = arith.negf %273 : vector<8x32xf32>
    %275 = math.exp %274 : vector<8x32xf32>
    %cst_72 = arith.constant 1.000000e+00 : f32
    %276 = vector.broadcast %cst_72 : f32 to vector<8x32xf32>
    %277 = arith.addf %276, %275 : vector<8x32xf32>
    %278 = arith.divf %276, %277 : vector<8x32xf32>
    %279 = arith.mulf %278, %251 : vector<8x32xf32>
    %280 = arith.truncf %279 : vector<8x32xf32> to vector<8x32xbf16>
    %cst_73 = arith.constant dense<0.000000e+00> : vector<8x32xf32>
    %281 = tpu.matmul %280, %3, %cst_73 {dimension_numbers = #tpu.dot_dimension_numbers<[1], [0], [0], [1], [0, 0, 1, 1], [], []>} : vector<8x32xbf16>, vector<32x32xbf16>, vector<8x32xf32> -> vector<8x32xf32>
    %282 = arith.addf %263, %281 : vector<8x32xf32>
    %283 = math.tanh %282 : vector<8x32xf32>
    %284 = arith.subf %283, %251 : vector<8x32xf32>
    %285 = arith.mulf %272, %284 : vector<8x32xf32>
    %286 = arith.addf %251, %285 : vector<8x32xf32>
    %287 = arith.addf %252, %286 : vector<8x32xf32>
    %cst_74 = arith.constant 1.250000e-01 : f32
    %288 = vector.broadcast %cst_74 : f32 to vector<8x32xf32>
    %289 = arith.mulf %287, %288 : vector<8x32xf32>
    %c0_75 = arith.constant 0 : index
    %c0_76 = arith.constant 0 : index
    %290 = vector.load %arg6[%c0_75, %c0_76] : memref<32x64xbf16, #tpu.memory_space<vmem>>, vector<32x64xbf16>
    %c0_77 = arith.constant 0 : index
    %c0_78 = arith.constant 0 : index
    %291 = vector.load %arg7[%c0_77, %c0_78] : memref<1x64xf32, #tpu.memory_space<vmem>>, vector<1x64xf32>
    %c0_79 = arith.constant 0 : index
    %c0_80 = arith.constant 0 : index
    %292 = vector.load %arg8[%c0_79, %c0_80] : memref<64x128xbf16, #tpu.memory_space<vmem>>, vector<64x128xbf16>
    %c0_81 = arith.constant 0 : index
    %c0_82 = arith.constant 0 : index
    %293 = vector.load %arg9[%c0_81, %c0_82] : memref<1x128xf32, #tpu.memory_space<vmem>>, vector<1x128xf32>
    %294 = arith.truncf %289 : vector<8x32xf32> to vector<8x32xbf16>
    %cst_83 = arith.constant dense<0.000000e+00> : vector<8x64xf32>
    %295 = tpu.matmul %294, %290, %cst_83 {dimension_numbers = #tpu.dot_dimension_numbers<[1], [0], [0], [1], [0, 0, 1, 1], [], []>} : vector<8x32xbf16>, vector<32x64xbf16>, vector<8x64xf32> -> vector<8x64xf32>
    %296 = vector.broadcast %291 : vector<1x64xf32> to vector<8x64xf32>
    %297 = arith.addf %295, %296 : vector<8x64xf32>
    %cst_84 = arith.constant 0.000000e+00 : f32
    %298 = vector.broadcast %cst_84 : f32 to vector<8x64xf32>
    %299 = arith.maximumf %297, %298 : vector<8x64xf32>
    %300 = arith.truncf %299 : vector<8x64xf32> to vector<8x64xbf16>
    %cst_85 = arith.constant dense<0.000000e+00> : vector<8x128xf32>
    %301 = tpu.matmul %300, %292, %cst_85 {dimension_numbers = #tpu.dot_dimension_numbers<[1], [0], [0], [1], [0, 0, 1, 1], [], []>} : vector<8x64xbf16>, vector<64x128xbf16>, vector<8x128xf32> -> vector<8x128xf32>
    %302 = vector.broadcast %293 : vector<1x128xf32> to vector<8x128xf32>
    %303 = arith.addf %301, %302 : vector<8x128xf32>
    %c0_86 = arith.constant 0 : index
    %c0_87 = arith.constant 0 : index
    %304 = vector.load %arg10[%c0_86, %c0_87] : memref<8x128xf32, #tpu.memory_space<vmem>>, vector<8x128xf32>
    tpu.vector_store %arg10[%c0_86, %c0_87], %303 {strides = array<i32>} : memref<8x128xf32, #tpu.memory_space<vmem>>, vector<8x128xf32>,
    return
  }
  func.func @transform_0(%arg0: i32) -> (i32, i32) {
    %c0_i32 = arith.constant 0 : i32
    %c0_i32_0 = arith.constant 0 : i32
    return %arg0, %c0_i32 : i32, i32
  }
  func.func @transform_1(%arg0: i32) -> (i32, i32) {
    %c0_i32 = arith.constant 0 : i32
    %c0_i32_0 = arith.constant 0 : i32
    %c0_i32_1 = arith.constant 0 : i32
    return %c0_i32, %c0_i32_0 : i32, i32
  }
  func.func @transform_2(%arg0: i32) -> (i32, i32) {
    %c0_i32 = arith.constant 0 : i32
    %c0_i32_0 = arith.constant 0 : i32
    %c0_i32_1 = arith.constant 0 : i32
    return %c0_i32, %c0_i32_0 : i32, i32
  }
  func.func @transform_3(%arg0: i32) -> (i32, i32) {
    %c0_i32 = arith.constant 0 : i32
    %c0_i32_0 = arith.constant 0 : i32
    %c0_i32_1 = arith.constant 0 : i32
    return %c0_i32, %c0_i32_0 : i32, i32
  }
  func.func @transform_4(%arg0: i32) -> (i32, i32) {
    %c0_i32 = arith.constant 0 : i32
    %c0_i32_0 = arith.constant 0 : i32
    %c0_i32_1 = arith.constant 0 : i32
    return %c0_i32, %c0_i32_0 : i32, i32
  }
  func.func @transform_5(%arg0: i32) -> (i32, i32) {
    %c0_i32 = arith.constant 0 : i32
    %c0_i32_0 = arith.constant 0 : i32
    %c0_i32_1 = arith.constant 0 : i32
    return %c0_i32, %c0_i32_0 : i32, i32
  }
  func.func @transform_6(%arg0: i32) -> (i32, i32) {
    %c0_i32 = arith.constant 0 : i32
    %c0_i32_0 = arith.constant 0 : i32
    %c0_i32_1 = arith.constant 0 : i32
    return %c0_i32, %c0_i32_0 : i32, i32
  }
  func.func @transform_7(%arg0: i32) -> (i32, i32) {
    %c0_i32 = arith.constant 0 : i32
    %c0_i32_0 = arith.constant 0 : i32
    %c0_i32_1 = arith.constant 0 : i32
    return %c0_i32, %c0_i32_0 : i32, i32
  }
  func.func @transform_8(%arg0: i32) -> (i32, i32) {
    %c0_i32 = arith.constant 0 : i32
    %c0_i32_0 = arith.constant 0 : i32
    %c0_i32_1 = arith.constant 0 : i32
    return %c0_i32, %c0_i32_0 : i32, i32
  }
  func.func @transform_9(%arg0: i32) -> (i32, i32) {
    %c0_i32 = arith.constant 0 : i32
    %c0_i32_0 = arith.constant 0 : i32
    return %arg0, %c0_i32 : i32, i32
  }
}

</mosaic_0001>

<bundles_post_ra>
// kernel: tpu_custom_call.1
= control target key start
LH: loop header
LB: loop body
LE: loop exit
PB: predicated region body
PF: predicated region fallthrough
CT: control target
= control target key end

     0   :  { %14 = vsyncpa [#allocation3], 0  ;;  %s4159_s0 = inlined_call_operand.vmem [shape: s32[16,8], index: 0, kind: input, shape index: {}]   ;;  %s4160_s1 = inlined_call_operand.hbm [shape: bf16[50,96], index: 1, kind: input, shape index: {}]   ;;  %s4161_s2 = inlined_call_operand.vmem [shape: bf16[32,32], index: 2, kind: input, shape index: {}]   ;;  %s4162_s3 = inlined_call_operand.hbm [shape: bf16[32,32], index: 3, kind: input, shape index: {}]   ;;  %s4163_s4 = inlined_call_operand.hbm [shape: bf16[32,32], index: 4, kind: input, shape index: {}]   ;;  %s4164_s5 = inlined_call_operand.hbm [shape: bf16[32,64], index: 5, kind: input, shape index: {}]   ;;  %s4165_s6 = inlined_call_operand.vmem [shape: f32[1,64], index: 6, kind: input, shape index: {}]   ;;  %s4166_s7 = inlined_call_operand.vmem [shape: bf16[64,128], index: 7, kind: input, shape index: {}]   ;;  %s4167_s8 = inlined_call_operand.vmem [shape: f32[1,128], index: 8, kind: input, shape index: {}]   ;;  %s4168_s9 = inlined_call_operand.hbm [shape: f32[16,128], index: 9, kind: output, shape index: {}]  }
   0x1   :  { %15 = vsyncpa [#allocation6], 0 }
   0x2   :  { %16 = vsyncpa [#allocation9], 0 }
   0x3   :  { %17 = vsyncpa [#allocation4], 0 }
   0x4   :  { %19 = vsyncpa [#allocation4 + $0x1], 0  ;;  %s3471_s30 = smov 0   ;;  %s3473_s10 = smov 0  }
   0x5   :  { %s3475_s11 = smov 0   ;;  %s3477_s12 = smov 0  }
   0x6 LB: > { %4177 = sst [smem:[#allocation15_spill]] %s3387_s30  ;;  %s3492_s13 = sadd.s32 4294967295, %s3399_s12   ;;  %s3399_s12 = sphi %s3477_s12, %s4198_s12   ;;  %s3395_s11 = sphi %s3475_s11, %s4200_s11   ;;  %s3391_s10 = sphi %s3473_s10, %s4202_s10   ;;  %s3387_s30 = sphi %s3471_s30, %s4201_s30  }
   0x7   : > { %4178 = sst [smem:[#allocation16_spill]] %s3395_s11  ;;  %s2492_s14 = sadd.s32 4294967294, %s3399_s12  }
   0x8   : > { %s3496_s15 = sadd.s32 1, %s3399_s12   ;;  %s226_s16 = sadd.s32 1, %s3395_s11 }
   0x9   : > { %4179 = sst [smem:[#allocation17_spill]] %s3496_s15  ;;  %s223_s17 = ssub.s32 %s3399_s12, %s3496_s15 }
   0xa   : > { %p236_p0 = scmp.ne.s32.totalorder %s3395_s11, %s3391_s10  ;;  %p224_p1 = scmp.eq.s32.totalorder %s223_s17, 0 }
   0xb   : > { %p237_p2 = scmp.eq.s32.totalorder %s3492_s13, 1  ;;  %p242_p3 = scmp.ne.s32.totalorder %s3391_s10, %s3387_s30 }
   0xc   : > { %p243_p4 = scmp.eq.s32.totalorder %s2492_s14, 1  ;;  %p2493_p7 = scmp.ge.s32.totalorder %s3399_s12, 1 }
   0xd   : > { %s3507_s18 = scalar_select %p224_p1, %s3395_s11, %s226_s16  }
   0xe   : > { %p3509_p5 = por %p237_p2, %p236_p0  ;;  %p3513_p6 = por %p243_p4, %p242_p3 }
   0xf   : > { %4180 = sst [smem:[#allocation18_spill]] %s3507_s18  ;;  %p250_p8 = scmp.lt.s32.totalorder %s3399_s12, 3 }
  0x10   : > { %s4181_s19 = scalar_select %p3509_p5, 1, 0 }
  0x11   : > { %s4182_s20 = scalar_select %p3513_p6, 1, 0 }
  0x12   : > { %p4169_p9 = scmp.eq.s32.totalorder %s3492_s13, 0  ;;  %p3520_p10 = pnand %p2493_p7, %p250_p8 }
  0x13   : > { %4183 = sst [smem:[#allocation19_spill]] %s4182_s20  ;;  %s3401_s22 = smov [#allocation5]  }
  0x14   : > { %s4184_s21 = scalar_select %p3520_p10, 1, 0 }
  0x15   : > { %p3022_p11 = pneg %p3520_p10  ;;  %s278_s23 = sshll.u32 %s3401_s22, 4  ;;  %s3526_s23 = int_to_ptr.vmem [resolvable:$true] %s278_s23 }
  0x16   : > { %s3402_s25 = smov [#allocation2]   ;;  %s3403_s27 = smov [#allocation7]  }
  0x17   : > { %p3530_p12 = pnand %p4169_p9, %p3022_p11  ;;  %s262_s26 = sshll.u32 %s3402_s25, 4  ;;  %s3534_s26 = int_to_ptr.vmem [resolvable:$true] %s262_s26 }
  0x18   : > { %s3536_s28 = sshll.u32 %s3403_s27, 4  ;;  %s3213_s16 = scalar_lea.hbm %s4162_s3, 256  ;;  %s292_s28 = int_to_ptr.vmem [resolvable:$true] %s3536_s28 }
  0x19   : > { %p3214_p13 = scmp.ne.s32.totalorder %s4162_s3, %s3213_s16  ;;  %p3546_p0 = pneg %p3530_p12 }
  0x1a   : > { %p3220_p3 = scmp.lt.u32.totalorder %s3213_s16, %s4162_s3 }
  0x1b   : > { %p3216_p1 = pnand %p3546_p0, %p3214_p13 }
  0x1d   : > { %p3217_p2 = pneg %p3216_p1 }
  0x1f   : > { %p3222_p4 = pnand %p3220_p3, %p3217_p2 }
  0x21   : > { %3225 = shalt.err (!%p3222_p4)
}
  0x22   : > { %s3226_s29 = scalar_lea.vmem %s3526_s23, 256  ;;  %p3234_p9 = scmp.lt.s32.totalorder %s3526_s23, %s3526_s23 }
  0x23   : > { %p3227_p7 = scmp.ne.s32.totalorder %s3526_s23, %s3226_s29  ;;  %p3235_p6 = scmp.lt.s32.totalorder %s3226_s29, %s3226_s29 }
  0x25   : > { %p3229_p8 = pnand %p3227_p7, %p3546_p0  ;;  %p3236_p13 = por %p3235_p6, %p3234_p9 }
  0x27   : > { %p3230_p11 = pneg %p3229_p8 }
  0x29   : > { %p3237_p1 = pnand %p3236_p13, %p3230_p11 }
  0x2b   : > { %3240 = shalt.err (!%p3237_p1)
}
  0x2c   : > { %s3404_s14 = smov 64   ;;  %s3405_s16 = smov 4  }
  0x2d   : > { %3028 = dma.hbm_to_vmem [thread:$0]  (!%p3530_p12), %s4162_s3, 256, %s3526_s23, [#allocation6], %s3404_s14, %s3404_s14, %s3405_s16  }
  0x2e   : > { %s3241_s29 = scalar_lea.hbm %s4160_s1, 448 }
  0x2f   : > { %p3242_p6 = scmp.ne.s32.totalorder %s4160_s1, %s3241_s29  ;;  %p3248_p3 = scmp.lt.u32.totalorder %s3241_s29, %s4160_s1 }
  0x31   : > { %p3244_p9 = pnand %p3242_p6, %p3546_p0 }
  0x33   : > { %p3245_p2 = pneg %p3244_p9 }
  0x35   : > { %p3250_p4 = pnand %p3248_p3, %p3245_p2 }
  0x37   : > { %3253 = shalt.err (!%p3250_p4)
}
  0x38   : > { %s3254_s23 = scalar_lea.vmem %s3534_s26, 448  ;;  %p3262_p13 = scmp.lt.s32.totalorder %s3534_s26, %s3534_s26 }
  0x39   : > { %p3255_p7 = scmp.ne.s32.totalorder %s3534_s26, %s3254_s23  ;;  %p3263_p1 = scmp.lt.s32.totalorder %s3254_s23, %s3254_s23 }
  0x3b   : > { %p3257_p8 = pnand %p3255_p7, %p3546_p0  ;;  %p3264_p6 = por %p3263_p1, %p3262_p13 }
  0x3d   : > { %p3258_p11 = pneg %p3257_p8 }
  0x3f   : > { %p3265_p9 = pnand %p3264_p6, %p3258_p11 }
  0x41   : > { %3268 = shalt.err (!%p3265_p9)
}
  0x42   : > { %3025 = dma.hbm_to_vmem [thread:$0]  (!%p3530_p12), %s4160_s1, 448, %s3534_s26, [#allocation3], %s3404_s14, %s3404_s14, %s3405_s16  }
  0x43   : > { %s3269_s17 = scalar_lea.hbm %s4163_s4, 256 }
  0x44   : > { %p3270_p2 = scmp.ne.s32.totalorder %s4163_s4, %s3269_s17  ;;  %p3276_p7 = scmp.lt.u32.totalorder %s3269_s17, %s4163_s4 }
  0x46   : > { %p3272_p3 = pnand %p3270_p2, %p3546_p0 }
  0x48   : > { %p3273_p4 = pneg %p3272_p3 }
  0x4a   : > { %p3278_p8 = pnand %p3276_p7, %p3273_p4 }
  0x4c   : > { %3281 = shalt.err (!%p3278_p8)
}
  0x4d   : > { %s3282_s23 = scalar_lea.vmem %s292_s28, 256  ;;  %p3290_p6 = scmp.lt.s32.totalorder %s292_s28, %s292_s28 }
  0x4e   : > { %p3283_p11 = scmp.ne.s32.totalorder %s292_s28, %s3282_s23  ;;  %p3291_p9 = scmp.lt.s32.totalorder %s3282_s23, %s3282_s23 }
  0x50   : > { %p3285_p13 = pnand %p3283_p11, %p3546_p0  ;;  %p3292_p5 = por %p3291_p9, %p3290_p6 }
  0x52   : > { %p3286_p1 = pneg %p3285_p13 }
  0x54   : > { %p3293_p10 = pnand %p3292_p5, %p3286_p1 }
  0x56   : > { %3296 = shalt.err (!%p3293_p10)
}
  0x57   : > { %3031 = dma.hbm_to_vmem [thread:$0]  (!%p3530_p12), %s4163_s4, 256, %s292_s28, [#allocation6], %s3404_s14, %s3404_s14, %s3405_s16  }
  0x58   : > { %s3406_s11 = smov [#allocation8]   ;;  %s3297_s22 = scalar_lea.hbm %s4164_s5, 256 }
  0x59   : > { %s304_s15 = sshll.u32 %s3406_s11, 4  ;;  %p3298_p5 = scmp.ne.s32.totalorder %s4164_s5, %s3297_s22  ;;  %s305_s15 = int_to_ptr.vmem [resolvable:$true] %s304_s15 }
  0x5a   : > { %p3304_p3 = scmp.lt.u32.totalorder %s3297_s22, %s4164_s5 }
  0x5b   : > { %p3300_p10 = pnand %p3298_p5, %p3546_p0 }
  0x5d   : > { %p3301_p2 = pneg %p3300_p10 }
  0x5f   : > { %p3306_p4 = pnand %p3304_p3, %p3301_p2 }
  0x61   : > { %3309 = shalt.err (!%p3306_p4)
}
  0x62   : > { %s3310_s28 = scalar_lea.vmem %s305_s15, 256  ;;  %p3318_p13 = scmp.lt.s32.totalorder %s305_s15, %s305_s15 }
  0x63   : > { %p3311_p7 = scmp.ne.s32.totalorder %s305_s15, %s3310_s28  ;;  %p3319_p1 = scmp.lt.s32.totalorder %s3310_s28, %s3310_s28 }
  0x65   : > { %p3313_p8 = pnand %p3311_p7, %p3546_p0  ;;  %p3320_p6 = por %p3319_p1, %p3318_p13 }
  0x67   : > { %p3314_p11 = pneg %p3313_p8 }
  0x69   : > { %p3321_p9 = pnand %p3320_p6, %p3314_p11 }
  0x6b   : > { %3324 = shalt.err (!%p3321_p9)
}
  0x6c   : > { %3034 = dma.hbm_to_vmem [thread:$0]  (!%p3530_p12), %s4164_s5, 256, %s305_s15, [#allocation9], %s3404_s14, %s3404_s14, %s3405_s16  }
  0x6d   : > { %p4187_p5 = scmp.ne.s32.totalorder %s4184_s21, 0 }
  0x6e   : > { %p4188_p0 = scmp.eq.s32.totalorder (!%p4187_p5), %s3492_s13, 0 }
  0x6f   : > { %336 = sbr.rel (%p4187_p5) target bundleno = 8147 (0x1fd3), region = 56 }
  0x76   : > { %3370 = dma.done.wait (%p4188_p0), [#allocation3], 448   ;;  %p4189_p10 = pmov %p4188_p0 }
  0x77   : > { %p4190_p2 = pmov %p4188_p0 }
  0x78   : > { %3372 = vsyncadd (%p4189_p10), [#allocation3], 4294966848 }
  0x79   : > { %3374 = dma.done.wait (%p4190_p2), [#allocation6], 512   ;;  %p4191_p3 = pmov %p4188_p0 }
  0x7a   : > { %p4192_p4 = pmov %p4188_p0 }
  0x7b   : > { %3376 = vsyncadd (%p4191_p3), [#allocation6], 4294966784 }
  0x7c   : > { %3378 = dma.done.wait (%p4192_p4), [#allocation9], 256   ;;  %p4193_p12 = pmov %p4188_p0 }
  0x7d   : > { %p383_p7 = scmp.lt.s32.totalorder %s3492_s13, 1  ;;  %v3407_v0 = vmov 0   ;;  %v3408_v1 = vmov 0.0   ;;  %vm3409_vm0 = vmmov 0   ;;  %v3673_v3 = vld [vmem:[%s4161_s2] sm:$0xff]   ;;  %v3679_v4 = vld [vmem:[%s4161_s2 + $0x8] sm:$0xff]   ;;  %v408_v12 = vlaneseq }
  0x7e   : > { %3380 = vsyncadd (%p4193_p12), [#allocation9], 4294967040  ;;  %3099 = vset.pattern.permute.xlu0 %v3407_v0  ;;  %2708 = vmatprep.subr.bf16.mxu1 %v3408_v1  ;;  %v3682_v5 = vld [vmem:[#allocation2] sm:$0xff]   ;;  %v3688_v7 = vld [vmem:[#allocation2 + $0x8] sm:$0xff]   ;;  %vm441_vm1 = vcmask 1040384   ;;  %vm437_vm3 = vcmask 408576  }
  0x7f   : > { %s384_s18 = scalar_select %p383_p7, %s3492_s13, 1  ;;  %2712 = vmatprep.mubr.msk.bf16.mxu1 %vm3409_vm0, %v3408_v1  ;;  %2696 = vmatprep.subr.bf16.mxu0 %v3408_v1  ;;  %v3685_v6 = vld [vmem:[#allocation5] sm:$0xff]   ;;  %v3692_v8 = vld [vmem:[#allocation5 + $0x8] sm:$0xff]   ;;  %v3694_v9 = vld [vmem:[#allocation2 + $0x10] sm:$0xff]   ;;  %v3720_v13 = vand.u32 127, %v408_v12  ;;  %vm497_vm4 = vcmask 261120  }
  0x80   : > { %2704 = vmatprep.mubr.msk.bf16.mxu0 %vm3409_vm0, %v3408_v1  ;;  %2709 = vmatpush3.bf16.msra.mxu1 %v3673_v3  ;;  %v3114_v10 = vld [vmem:[#allocation2 + $0x18] ss:$0 sps:$4 sm:$0x11]   ;;  %s3410_s22 = smov 32   ;;  %v3728_v25 = vld [vmem:[#allocation7] sm:$0xff]   ;;  %s3411_s25 = smov 96  }
  0x81   : > { %s2505_s21 = sshll.u32 %s384_s18, 3  ;;  %2710 = vmatprep.subr.bf16.mxu1 %v3408_v1  ;;  %2697 = vmatpush3.bf16.msra.mxu0 %v3682_v5  ;;  %v3706_v11 = vsel %vm441_vm1, %v3114_v10, 0  ;;  %v3731_v26 = vld [vmem:[#allocation7 + $0x8] sm:$0xff]   ;;  %v3412_v41 = vmov 1   ;;  %s3413_s27 = smov 64   ;;  %vm2333_vm12 = vcmask 523264  }
  0x82   : > { %s3664_s16 = scalar_lea.vmem %s4159_s0, %s2505_s21  ;;  %2698 = vmatprep.subr.bf16.mxu0 %v3408_v1  ;;  %3100 = vset.pattern.permute.xlu1 %v3412_v41  ;;  %s2573_s23 = sshll.u32 %s3492_s13, 7 }
  0x83   : > { %v3667_v2 = vld [vmem:[%s3664_s16] sm:$0xff]  ;;  %s4117_s21 = scalar_lea.hbm %s4168_s9, %s2573_s23  ;;  %p4194_p11 = scmp.ne.s32.totalorder %s4181_s19, 0 }
  0x84   : > { %411 = vperm.xlu0 %3099, %v3667_v2   ;;  %2711 = vmatpush3.bf16.msra.mxu1 %v3679_v4  ;;  %s3420_s14 = smov [#allocation10]  }
  0x85   : > { %2716 = vmatprep.subr.bf16.mxu1 %v3408_v1  ;;  %2699 = vmatpush3.bf16.msra.mxu0 %v3688_v7 }
  0x86   : > { %2700 = vmatprep.subr.bf16.mxu0 %v3408_v1 }
  0x87   : > { %2713 = vmatmul.mubr.bf16.vlgmr.msra.gmra.mrb[0].mxu1 %v3407_v0 }
  0x88   : > { %2717 = vmatpush3.bf16.msra.mxu1 %v3685_v6  ;;  %2720 = vmatprep.mubr.msk.bf16.mxu1 %vm3409_vm0, %v3408_v1 }
  0x89   : > { %2718 = vmatprep.subr.bf16.mxu1 %v3408_v1  ;;  %2701 = vmatpush3.bf16.msra.mxu0 %v3694_v9 }
  0x8a   : > { %2702 = vmatprep.subr.bf16.mxu0 %v3408_v1 }
  0x8c   : > { %2719 = vmatpush3.bf16.msra.mxu1 %v3692_v8 }
  0x8d   : > { %2732 = vmatprep.subr.bf16.mxu1 %v3408_v1  ;;  %2703 = vmatpush3.bf16.msra.mxu0 %v3706_v11 }
  0x8e   : > { %2724 = vmatprep.subr.bf16.mxu0 %v3408_v1 }
  0x8f   : > { %2721 = vmatmul.mubr.bf16.vlgmr.msra.gmra.mrb[4].mxu1 %v3407_v0 }
  0x90   : > { %2733 = vmatpush3.bf16.msra.mxu1 %v3682_v5  ;;  %2740 = vmatprep.mubr.msk.bf16.mxu1 %vm3409_vm0, %v3408_v1 }
  0x91   : > { %2734 = vmatprep.subr.bf16.mxu1 %v3408_v1 }
  0x94   : > { %2735 = vmatpush3.bf16.msra.mxu1 %v3688_v7 }
  0x95   : > { %2736 = vmatprep.subr.bf16.mxu1 %v3408_v1 }
  0x98   : > { %2737 = vmatpush3.bf16.msra.mxu1 %v3694_v9 }
  0x99   : > { %2738 = vmatprep.subr.bf16.mxu1 %v3408_v1 }
  0x9c   : > { %2739 = vmatpush3.bf16.msra.mxu1 %v3706_v11 }
  0x9d   : > { %2760 = vmatprep.subr.bf16.mxu1 %v3408_v1 }
 0x103   : > { %v412_v14 = vpop.permute.xlu0 %411 }
 0x104   : > { %vm413_vm2 = vcmp.eq.s32.totalorder %v3720_v13, %v412_v14 }
 0x105   : > { %v414_v15 = vsel %vm413_vm2, 1.0, %v3408_v1 }
 0x106   : > { %v415_v16 = vpack.c.bf16 %v414_v15, %v414_v15 }
 0x108   : > { %2705 = vmatmul.mubr.msk.bf16.vlgmr.msra.gmra.mrb[0].mxu0 %vm437_vm3, %v415_v16 }
 0x109   : > { %2728 = vmatprep.mubr.msk.bf16.mxu0 %vm3409_vm0, %v3408_v1  ;;  %2725 = vmatpush3.bf16.msra.mxu0 %v3728_v25 }
 0x10a   : > { %2726 = vmatprep.subr.bf16.mxu0 %v3408_v1 }
 0x10d   : > { %2727 = vmatpush3.bf16.msra.mxu0 %v3731_v26 }
 0x10e   : > { %2744 = vmatprep.subr.bf16.mxu0 %v3408_v1 }
 0x15a   : > { %v535_v17 = vpop.f32.mrb[0].mxu1 }
 0x15b   : > { %v2714_v18 = vpop.f32.mrb[1].mxu1 }
 0x15c   : > { %v538_v19 = vpop.f32.mrb[2].mxu1 }
 0x15d   : > { %v2715_v20 = vpop.f32.mrb[3].mxu1 }
 0x162   : > { %v587_v21 = vpop.f32.mrb[4].mxu1 }
 0x163   : > { %601 = vrot.lane.b32.xlu0 %v587_v21, %s3410_s22  ;;  %v2722_v22 = vpop.f32.mrb[5].mxu1 }
 0x164   : > { %v590_v23 = vpop.f32.mrb[6].mxu1 }
 0x165   : > { %v2723_v24 = vpop.f32.mrb[7].mxu1 }
 0x1d5   : > { %v602_v27 = vpop.permute.xlu0 %601 }
 0x1db   : > { %v479_v28 = vpop.f32.mrb[0].mxu0 }
 0x1dc   : > { %v593_v29 = vadd.f32 %v535_v17, %v479_v28  ;;  %v604_v30 = vadd.f32 %v602_v27, %v479_v28  ;;  %v2706_v31 = vpop.f32.mrb[1].mxu0 }
 0x1dd   : > { %v482_v32 = vpop.f32.mrb[2].mxu0  ;;  %v3414_v31 = vmov 2  }
 0x1de   : > { %v2516_v33 = vmul.f32 -1.442695, %v604_v30  ;;  %v2707_v34 = vpop.f32.mrb[3].mxu0  ;;  %v2515_v52 = vmul.f32 -1.442695, %v593_v29  ;;  %3101 = vset.pattern.permute.xlu0 %v3414_v31 }
 0x1e0   : > { %3123 = vpow2.f32 %v2516_v33 }
 0x1ea   : > { %v3124_v35 = vpop.eup %3123 }
 0x1eb   : > { %v608_v36 = vadd.f32 1.0, %v3124_v35 }
 0x1ed   : > { %3125 = vrcp.f32 %v608_v36 }
 0x1f7   : > { %v3126_v37 = vpop.eup %3125 }
 0x1f8   : > { %v611_v38 = vmul.f32 0.0, %v3126_v37 }
 0x1fa   : > { %v612_v39 = vpack.c.bf16 %v611_v38, %v611_v38 }
 0x1fc   : > { %614 = vrot.lane.b32.xlu1 %v612_v39, %s3411_s25 }
 0x26e   : > { %v615_v40 = vpop.permute.xlu1 %614 }
 0x26f   : > { %2729 = vmatmul.mubr.msk.bf16.vlgmr.msra.gmra.mrb[4].mxu0 %vm497_vm4, %v615_v40 }
 0x270   : > { %2745 = vmatpush3.bf16.msra.mxu0 %v3673_v3  ;;  %2748 = vmatprep.mubr.msk.bf16.mxu0 %vm3409_vm0, %v3408_v1 }
 0x271   : > { %2746 = vmatprep.subr.bf16.mxu0 %v3408_v1 }
 0x274   : > { %2747 = vmatpush3.bf16.msra.mxu0 %v3679_v4 }
 0x275   : > { %2752 = vmatprep.subr.bf16.mxu0 %v3408_v1 }
 0x342   : > { %v665_v42 = vpop.f32.mrb[4].mxu0 }
 0x343   : > { %672 = vrot.lane.b32.xlu1 %v665_v42, %s3413_s27  ;;  %v2730_v43 = vpop.f32.mrb[5].mxu0 }
 0x344   : > { %v668_v44 = vpop.f32.mrb[6].mxu0 }
 0x345   : > { %v2731_v45 = vpop.f32.mrb[7].mxu0 }
 0x347   : > { %685 = vperm.xlu1 %3100, %v3667_v2  }
 0x3b5   : > { %v673_v46 = vpop.permute.xlu1 %672 }
 0x3b6   : > { %v675_v47 = vadd.f32 %v673_v46, %v479_v28 }
 0x3b8   : > { %3127 = vtanh.f32 %v675_v47 }
 0x3b9   : > { %3129 = vpow2.f32 %v2515_v52 }
 0x3c2   : > { %v3128_v48 = vpop.eup %3127 }
 0x3c3   : > { %678 = vrot.lane.b32.xlu0 %v3128_v48, %s3413_s27  ;;  %v3130_v53 = vpop.eup %3129 }
 0x3c4   : > { %v597_v54 = vadd.f32 1.0, %v3130_v53 }
 0x3c6   : > { %v686_v49 = vpop.permute.xlu1 %685  ;;  %3131 = vrcp.f32 %v597_v54 }
 0x3c7   : > { %vm687_vm5 = vcmp.eq.s32.totalorder %v3720_v13, %v686_v49 }
 0x3c8   : > { %v688_v50 = vsel %vm687_vm5, 1.0, %v3408_v1 }
 0x3c9   : > { %v689_v51 = vpack.c.bf16 %v688_v50, %v688_v50 }
 0x3cb   : > { %2741 = vmatmul.mubr.msk.bf16.vlgmr.msra.gmra.mrb[8].mxu1 %vm437_vm3, %v689_v51 }
 0x3cc   : > { %2761 = vmatpush3.bf16.msra.mxu1 %v3728_v25  ;;  %2764 = vmatprep.mubr.msk.bf16.mxu1 %vm3409_vm0, %v3408_v1 }
 0x3cd   : > { %2762 = vmatprep.subr.bf16.mxu1 %v3408_v1 }
 0x3d0   : > { %2763 = vmatpush3.bf16.msra.mxu1 %v3731_v26  ;;  %v3132_v55 = vpop.eup %3131 }
 0x3d1   : > { %2780 = vmatprep.subr.bf16.mxu1 %v3408_v1 }
 0x435   : > { %v679_v56 = vpop.permute.xlu0 %678 }
 0x436   : > { %v3756_v57 = vmul.f32 %v3132_v55, %v679_v56 }
 0x438   : > { %836 = vrot.lane.b32.xlu1 %v3756_v57, %s3410_s22  ;;  %v733_v58 = vpack.c.bf16 %v3756_v57, %v3756_v57 }
 0x43a   : > { %2749 = vmatmul.mubr.msk.bf16.vlgmr.msra.gmra.mrb[8].mxu0 %vm497_vm4, %v733_v58 }
 0x43b   : > { %2753 = vmatpush3.bf16.msra.mxu0 %v3685_v6  ;;  %2756 = vmatprep.mubr.msk.bf16.mxu0 %vm3409_vm0, %v3408_v1 }
 0x43c   : > { %2754 = vmatprep.subr.bf16.mxu0 %v3408_v1 }
 0x43f   : > { %2755 = vmatpush3.bf16.msra.mxu0 %v3692_v8 }
 0x440   : > { %2768 = vmatprep.subr.bf16.mxu0 %v3408_v1 }
 0x442   : > { %2757 = vmatmul.mubr.msk.bf16.vlgmr.msra.gmra.mrb[12].mxu0 %vm497_vm4, %v733_v58 }
 0x443   : > { %2769 = vmatpush3.bf16.msra.mxu0 %v3682_v5  ;;  %2776 = vmatprep.mubr.msk.bf16.mxu0 %vm3409_vm0, %v3408_v1 }
 0x444   : > { %2770 = vmatprep.subr.bf16.mxu0 %v3408_v1 }
 0x447   : > { %2771 = vmatpush3.bf16.msra.mxu0 %v3688_v7 }
 0x448   : > { %2772 = vmatprep.subr.bf16.mxu0 %v3408_v1 }
 0x44b   : > { %2773 = vmatpush3.bf16.msra.mxu0 %v3694_v9 }
 0x44c   : > { %2774 = vmatprep.subr.bf16.mxu0 %v3408_v1 }
 0x44f   : > { %2775 = vmatpush3.bf16.msra.mxu0 %v3706_v11 }
 0x450   : > { %2796 = vmatprep.subr.bf16.mxu0 %v3408_v1 }
 0x49e   : > { %v727_v59 = vpop.f32.mrb[8].mxu1 }
 0x49f   : > { %v2742_v60 = vpop.f32.mrb[9].mxu1 }
 0x4a0   : > { %v730_v61 = vpop.f32.mrb[10].mxu1 }
 0x4a1   : > { %v2743_v62 = vpop.f32.mrb[11].mxu1 }
 0x4aa   : > { %v837_v27 = vpop.permute.xlu1 %836 }
 0x50d   : > { %v771_v63 = vpop.f32.mrb[8].mxu0 }
 0x50e   : > { %v817_v0 = vadd.f32 %v771_v63, %v727_v59  ;;  %v2750_v10 = vpop.f32.mrb[9].mxu0 }
 0x50f   : > { %v774_v12 = vpop.f32.mrb[10].mxu0 }
 0x510   : > { %v2751_v14 = vpop.f32.mrb[11].mxu0  ;;  %v2523_v44 = vmul.f32 -1.442695, %v817_v0 }
 0x515   : > { %v811_v15 = vpop.f32.mrb[12].mxu0 }
 0x516   : > { %825 = vrot.lane.b32.xlu0 %v811_v15, %s3410_s22  ;;  %v2758_v16 = vpop.f32.mrb[13].mxu0 }
 0x517   : > { %v814_v17 = vpop.f32.mrb[14].mxu0 }
 0x518   : > { %v2759_v18 = vpop.f32.mrb[15].mxu0 }
 0x588   : > { %v826_v19 = vpop.permute.xlu0 %825 }
 0x589   : > { %v828_v20 = vadd.f32 %v826_v19, %v727_v59 }
 0x58b   : > { %v2524_v21 = vmul.f32 -1.442695, %v828_v20 }
 0x58d   : > { %3133 = vpow2.f32 %v2524_v21 }
 0x597   : > { %v3134_v22 = vpop.eup %3133 }
 0x598   : > { %v832_v23 = vadd.f32 1.0, %v3134_v22 }
 0x59a   : > { %3135 = vrcp.f32 %v832_v23  ;;  %v3415_v23 = vmov 3  }
 0x5a4   : > { %v3136_v24 = vpop.eup %3135 }
 0x5a5   : > { %v839_v28 = vmul.f32 %v3136_v24, %v837_v27 }
 0x5a7   : > { %v840_v29 = vpack.c.bf16 %v839_v28, %v839_v28 }
 0x5a9   : > { %842 = vrot.lane.b32.xlu0 %v840_v29, %s3411_s25 }
 0x5ad   : > { %893 = vrot.lane.b32.xlu0 %v3756_v57, %s3413_s27 }
 0x5b1   : > { %905 = vperm.xlu0 %3101, %v3667_v2  }
 0x5b5   : > { %3102 = vset.pattern.permute.xlu0 %v3415_v23 }
 0x61b   : > { %v843_v30 = vpop.permute.xlu0 %842 }
 0x61c   : > { %2765 = vmatmul.mubr.msk.bf16.vlgmr.msra.gmra.mrb[12].mxu1 %vm497_vm4, %v843_v30 }
 0x61d   : > { %2781 = vmatpush3.bf16.msra.mxu1 %v3673_v3  ;;  %2784 = vmatprep.mubr.msk.bf16.mxu1 %vm3409_vm0, %v3408_v1 }
 0x61e   : > { %2782 = vmatprep.subr.bf16.mxu1 %v3408_v1 }
 0x61f   : > { %v894_v36 = vpop.permute.xlu0 %893 }
 0x621   : > { %2783 = vmatpush3.bf16.msra.mxu1 %v3679_v4 }
 0x622   : > { %2788 = vmatprep.subr.bf16.mxu1 %v3408_v1 }
 0x630   : > { %v906_v39 = vpop.permute.xlu0 %905 }
 0x631   : > { %vm907_vm6 = vcmp.eq.s32.totalorder %v3720_v13, %v906_v39 }
 0x632   : > { %v908_v40 = vsel %vm907_vm6, 1.0, %v3408_v1 }
 0x633   : > { %v909_v41 = vpack.c.bf16 %v908_v40, %v908_v40 }
 0x635   : > { %2777 = vmatmul.mubr.msk.bf16.vlgmr.msra.gmra.mrb[16].mxu0 %vm437_vm3, %v909_v41 }
 0x636   : > { %2797 = vmatpush3.bf16.msra.mxu0 %v3728_v25  ;;  %2800 = vmatprep.mubr.msk.bf16.mxu0 %vm3409_vm0, %v3408_v1 }
 0x637   : > { %2798 = vmatprep.subr.bf16.mxu0 %v3408_v1 }
 0x63a   : > { %2799 = vmatpush3.bf16.msra.mxu0 %v3731_v26 }
 0x63b   : > { %2816 = vmatprep.subr.bf16.mxu0 %v3408_v1 }
 0x6ef   : > { %v881_v32 = vpop.f32.mrb[12].mxu1 }
 0x6f0   : > { %888 = vrot.lane.b32.xlu1 %v881_v32, %s3413_s27  ;;  %v2766_v33 = vpop.f32.mrb[13].mxu1 }
 0x6f1   : > { %v884_v34 = vpop.f32.mrb[14].mxu1 }
 0x6f2   : > { %v2767_v35 = vpop.f32.mrb[15].mxu1 }
 0x708   : > { %v947_v52 = vpop.f32.mrb[16].mxu0 }
 0x709   : > { %v2778_v53 = vpop.f32.mrb[17].mxu0 }
 0x70a   : > { %v950_v54 = vpop.f32.mrb[18].mxu0 }
 0x70b   : > { %v2779_v55 = vpop.f32.mrb[19].mxu0 }
 0x762   : > { %v889_v37 = vpop.permute.xlu1 %888 }
 0x763   : > { %v891_v38 = vadd.f32 %v889_v37, %v727_v59 }
 0x765   : > { %3137 = vtanh.f32 %v891_v38 }
 0x766   : > { %3139 = vpow2.f32 %v2523_v44 }
 0x76f   : > { %v3138_v42 = vpop.eup %3137 }
 0x770   : > { %v896_v43 = vsub.f32 %v3138_v42, %v894_v36  ;;  %v3140_v45 = vpop.eup %3139 }
 0x771   : > { %v821_v46 = vadd.f32 1.0, %v3140_v45 }
 0x772   : > { %898 = vrot.lane.b32.xlu1 %v896_v43, %s3413_s27 }
 0x773   : > { %3141 = vrcp.f32 %v821_v46 }
 0x77d   : > { %v3142_v47 = vpop.eup %3141 }
 0x7e4   : > { %v899_v48 = vpop.permute.xlu1 %898 }
 0x7e5   : > { %v901_v49 = vmul.f32 %v3142_v47, %v899_v48 }
 0x7e7   : > { %v3804_v50 = vadd.f32 %v901_v49, %v3756_v57 }
 0x7e9   : > { %v953_v51 = vpack.c.bf16 %v3804_v50, %v3804_v50 }
 0x7eb   : > { %2785 = vmatmul.mubr.msk.bf16.vlgmr.msra.gmra.mrb[16].mxu1 %vm497_vm4, %v953_v51 }
 0x7ec   : > { %2789 = vmatpush3.bf16.msra.mxu1 %v3685_v6  ;;  %2792 = vmatprep.mubr.msk.bf16.mxu1 %vm3409_vm0, %v3408_v1 }
 0x7ed   : > { %2790 = vmatprep.subr.bf16.mxu1 %v3408_v1 }
 0x7f0   : > { %2791 = vmatpush3.bf16.msra.mxu1 %v3692_v8 }
 0x7f1   : > { %2804 = vmatprep.subr.bf16.mxu1 %v3408_v1 }
 0x7f3   : > { %2793 = vmatmul.mubr.msk.bf16.vlgmr.msra.gmra.mrb[20].mxu1 %vm497_vm4, %v953_v51 }
 0x7f4   : > { %2805 = vmatpush3.bf16.msra.mxu1 %v3682_v5  ;;  %2812 = vmatprep.mubr.msk.bf16.mxu1 %vm3409_vm0, %v3408_v1 }
 0x7f5   : > { %2806 = vmatprep.subr.bf16.mxu1 %v3408_v1 }
 0x7f8   : > { %2807 = vmatpush3.bf16.msra.mxu1 %v3688_v7 }
 0x7f9   : > { %2808 = vmatprep.subr.bf16.mxu1 %v3408_v1 }
 0x7fc   : > { %2809 = vmatpush3.bf16.msra.mxu1 %v3694_v9 }
 0x7fd   : > { %2810 = vmatprep.subr.bf16.mxu1 %v3408_v1 }
 0x800   : > { %2811 = vmatpush3.bf16.msra.mxu1 %v3706_v11 }
 0x801   : > { %2832 = vmatprep.subr.bf16.mxu1 %v3408_v1 }
 0x8be   : > { %v991_v56 = vpop.f32.mrb[16].mxu1 }
 0x8bf   : > { %v1037_v58 = vadd.f32 %v991_v56, %v947_v52  ;;  %v2786_v59 = vpop.f32.mrb[17].mxu1 }
 0x8c0   : > { %v994_v60 = vpop.f32.mrb[18].mxu1 }
 0x8c1   : > { %v2787_v61 = vpop.f32.mrb[19].mxu1  ;;  %v2529_v38 = vmul.f32 -1.442695, %v1037_v58 }
 0x8c6   : > { %v1031_v62 = vpop.f32.mrb[20].mxu1 }
 0x8c7   : > { %1045 = vrot.lane.b32.xlu1 %v1031_v62, %s3410_s22  ;;  %v2794_v63 = vpop.f32.mrb[21].mxu1 }
 0x8c8   : > { %v1034_v0 = vpop.f32.mrb[22].mxu1 }
 0x8c9   : > { %v2795_v10 = vpop.f32.mrb[23].mxu1 }
 0x8cb   : > { %1056 = vrot.lane.b32.xlu1 %v3804_v50, %s3410_s22 }
 0x939   : > { %v1046_v12 = vpop.permute.xlu1 %1045 }
 0x93a   : > { %v1048_v14 = vadd.f32 %v1046_v12, %v947_v52 }
 0x93c   : > { %v2530_v15 = vmul.f32 -1.442695, %v1048_v14 }
 0x93d   : > { %v1057_v19 = vpop.permute.xlu1 %1056 }
 0x93e   : > { %3143 = vpow2.f32 %v2530_v15 }
 0x948   : > { %v3144_v16 = vpop.eup %3143 }
 0x949   : > { %v1052_v17 = vadd.f32 1.0, %v3144_v16 }
 0x94b   : > { %3145 = vrcp.f32 %v1052_v17 }
 0x955   : > { %v3146_v18 = vpop.eup %3145 }
 0x956   : > { %v1059_v20 = vmul.f32 %v3146_v18, %v1057_v19  ;;  %v3416_v18 = vmov 4  }
 0x958   : > { %v1060_v21 = vpack.c.bf16 %v1059_v20, %v1059_v20 }
 0x95a   : > { %1062 = vrot.lane.b32.xlu0 %v1060_v21, %s3411_s25 }
 0x95e   : > { %1113 = vrot.lane.b32.xlu0 %v3804_v50, %s3413_s27 }
 0x962   : > { %1125 = vperm.xlu0 %3102, %v3667_v2  }
 0x966   : > { %3103 = vset.pattern.permute.xlu0 %v3416_v18 }
 0x9cc   : > { %v1063_v22 = vpop.permute.xlu0 %1062 }
 0x9cd   : > { %2801 = vmatmul.mubr.msk.bf16.vlgmr.msra.gmra.mrb[20].mxu0 %vm497_vm4, %v1063_v22 }
 0x9ce   : > { %2817 = vmatpush3.bf16.msra.mxu0 %v3673_v3  ;;  %2820 = vmatprep.mubr.msk.bf16.mxu0 %vm3409_vm0, %v3408_v1 }
 0x9cf   : > { %2818 = vmatprep.subr.bf16.mxu0 %v3408_v1 }
 0x9d0   : > { %v1114_v30 = vpop.permute.xlu0 %1113 }
 0x9d2   : > { %2819 = vmatpush3.bf16.msra.mxu0 %v3679_v4 }
 0x9d3   : > { %2824 = vmatprep.subr.bf16.mxu0 %v3408_v1 }
 0x9e1   : > { %v1126_v33 = vpop.permute.xlu0 %1125 }
 0x9e2   : > { %vm1127_vm7 = vcmp.eq.s32.totalorder %v3720_v13, %v1126_v33 }
 0x9e3   : > { %v1128_v34 = vsel %vm1127_vm7, 1.0, %v3408_v1 }
 0x9e4   : > { %v1129_v35 = vpack.c.bf16 %v1128_v34, %v1128_v34 }
 0x9e6   : > { %2813 = vmatmul.mubr.msk.bf16.vlgmr.msra.gmra.mrb[24].mxu1 %vm437_vm3, %v1129_v35 }
 0x9e7   : > { %2833 = vmatpush3.bf16.msra.mxu1 %v3728_v25  ;;  %2836 = vmatprep.mubr.msk.bf16.mxu1 %vm3409_vm0, %v3408_v1 }
 0x9e8   : > { %2834 = vmatprep.subr.bf16.mxu1 %v3408_v1 }
 0x9eb   : > { %2835 = vmatpush3.bf16.msra.mxu1 %v3731_v26 }
 0x9ec   : > { %2852 = vmatprep.subr.bf16.mxu1 %v3408_v1 }
 0xaa0   : > { %v1101_v24 = vpop.f32.mrb[20].mxu0 }
 0xaa1   : > { %1108 = vrot.lane.b32.xlu1 %v1101_v24, %s3413_s27  ;;  %v2802_v27 = vpop.f32.mrb[21].mxu0 }
 0xaa2   : > { %v1104_v28 = vpop.f32.mrb[22].mxu0 }
 0xaa3   : > { %v2803_v29 = vpop.f32.mrb[23].mxu0 }
 0xab9   : > { %v1167_v46 = vpop.f32.mrb[24].mxu1 }
 0xaba   : > { %v2814_v47 = vpop.f32.mrb[25].mxu1 }
 0xabb   : > { %v1170_v48 = vpop.f32.mrb[26].mxu1 }
 0xabc   : > { %v2815_v49 = vpop.f32.mrb[27].mxu1 }
 0xb13   : > { %v1109_v31 = vpop.permute.xlu1 %1108 }
 0xb14   : > { %v1111_v32 = vadd.f32 %v1109_v31, %v947_v52 }
 0xb16   : > { %3147 = vtanh.f32 %v1111_v32 }
 0xb17   : > { %3149 = vpow2.f32 %v2529_v38 }
 0xb20   : > { %v3148_v36 = vpop.eup %3147 }
 0xb21   : > { %v1116_v37 = vsub.f32 %v3148_v36, %v1114_v30  ;;  %v3150_v39 = vpop.eup %3149 }
 0xb22   : > { %v1041_v40 = vadd.f32 1.0, %v3150_v39 }
 0xb23   : > { %1118 = vrot.lane.b32.xlu1 %v1116_v37, %s3413_s27 }
 0xb24   : > { %3151 = vrcp.f32 %v1041_v40 }
 0xb2e   : > { %v3152_v41 = vpop.eup %3151 }
 0xb95   : > { %v1119_v42 = vpop.permute.xlu1 %1118 }
 0xb96   : > { %v1121_v43 = vmul.f32 %v3152_v41, %v1119_v42 }
 0xb98   : > { %v3852_v44 = vadd.f32 %v1121_v43, %v3804_v50 }
 0xb9a   : > { %v1173_v45 = vpack.c.bf16 %v3852_v44, %v3852_v44 }
 0xb9c   : > { %2821 = vmatmul.mubr.msk.bf16.vlgmr.msra.gmra.mrb[24].mxu0 %vm497_vm4, %v1173_v45 }
 0xb9d   : > { %2825 = vmatpush3.bf16.msra.mxu0 %v3685_v6  ;;  %2828 = vmatprep.mubr.msk.bf16.mxu0 %vm3409_vm0, %v3408_v1 }
 0xb9e   : > { %2826 = vmatprep.subr.bf16.mxu0 %v3408_v1 }
 0xba1   : > { %2827 = vmatpush3.bf16.msra.mxu0 %v3692_v8 }
 0xba2   : > { %2840 = vmatprep.subr.bf16.mxu0 %v3408_v1 }
 0xba4   : > { %2829 = vmatmul.mubr.msk.bf16.vlgmr.msra.gmra.mrb[28].mxu0 %vm497_vm4, %v1173_v45 }
 0xba5   : > { %2841 = vmatpush3.bf16.msra.mxu0 %v3682_v5  ;;  %2848 = vmatprep.mubr.msk.bf16.mxu0 %vm3409_vm0, %v3408_v1 }
 0xba6   : > { %2842 = vmatprep.subr.bf16.mxu0 %v3408_v1 }
 0xba9   : > { %2843 = vmatpush3.bf16.msra.mxu0 %v3688_v7 }
 0xbaa   : > { %2844 = vmatprep.subr.bf16.mxu0 %v3408_v1 }
 0xbad   : > { %2845 = vmatpush3.bf16.msra.mxu0 %v3694_v9 }
 0xbae   : > { %2846 = vmatprep.subr.bf16.mxu0 %v3408_v1 }
 0xbb1   : > { %2847 = vmatpush3.bf16.msra.mxu0 %v3706_v11 }
 0xbb2   : > { %2868 = vmatprep.subr.bf16.mxu0 %v3408_v1 }
 0xc6f   : > { %v1211_v51 = vpop.f32.mrb[24].mxu0 }
 0xc70   : > { %v1257_v52 = vadd.f32 %v1211_v51, %v1167_v46  ;;  %v2822_v53 = vpop.f32.mrb[25].mxu0 }
 0xc71   : > { %v1214_v54 = vpop.f32.mrb[26].mxu0 }
 0xc72   : > { %v2823_v55 = vpop.f32.mrb[27].mxu0  ;;  %v2535_v33 = vmul.f32 -1.442695, %v1257_v52 }
 0xc77   : > { %v1251_v56 = vpop.f32.mrb[28].mxu0 }
 0xc78   : > { %1265 = vrot.lane.b32.xlu1 %v1251_v56, %s3410_s22  ;;  %v2830_v58 = vpop.f32.mrb[29].mxu0 }
 0xc79   : > { %v1254_v59 = vpop.f32.mrb[30].mxu0 }
 0xc7a   : > { %v2831_v60 = vpop.f32.mrb[31].mxu0 }
 0xc7c   : > { %1276 = vrot.lane.b32.xlu1 %v3852_v44, %s3410_s22 }
 0xcea   : > { %v1266_v61 = vpop.permute.xlu1 %1265 }
 0xceb   : > { %v1268_v62 = vadd.f32 %v1266_v61, %v1167_v46 }
 0xced   : > { %v2536_v63 = vmul.f32 -1.442695, %v1268_v62 }
 0xcee   : > { %v1277_v14 = vpop.permute.xlu1 %1276 }
 0xcef   : > { %3153 = vpow2.f32 %v2536_v63 }
 0xcf9   : > { %v3154_v0 = vpop.eup %3153 }
 0xcfa   : > { %v1272_v10 = vadd.f32 1.0, %v3154_v0 }
 0xcfc   : > { %3155 = vrcp.f32 %v1272_v10 }
 0xd06   : > { %v3156_v12 = vpop.eup %3155 }
 0xd07   : > { %v1279_v15 = vmul.f32 %v3156_v12, %v1277_v14  ;;  %v3417_v14 = vmov 5  }
 0xd09   : > { %v1280_v16 = vpack.c.bf16 %v1279_v15, %v1279_v15 }
 0xd0b   : > { %1282 = vrot.lane.b32.xlu0 %v1280_v16, %s3411_s25 }
 0xd0f   : > { %1333 = vrot.lane.b32.xlu0 %v3852_v44, %s3413_s27 }
 0xd13   : > { %1345 = vperm.xlu0 %3103, %v3667_v2  }
 0xd17   : > { %3104 = vset.pattern.permute.xlu0 %v3417_v14 }
 0xd7d   : > { %v1283_v17 = vpop.permute.xlu0 %1282 }
 0xd7e   : > { %2837 = vmatmul.mubr.msk.bf16.vlgmr.msra.gmra.mrb[28].mxu1 %vm497_vm4, %v1283_v17 }
 0xd7f   : > { %2853 = vmatpush3.bf16.msra.mxu1 %v3673_v3  ;;  %2856 = vmatprep.mubr.msk.bf16.mxu1 %vm3409_vm0, %v3408_v1 }
 0xd80   : > { %2854 = vmatprep.subr.bf16.mxu1 %v3408_v1 }
 0xd81   : > { %v1334_v23 = vpop.permute.xlu0 %1333 }
 0xd83   : > { %2855 = vmatpush3.bf16.msra.mxu1 %v3679_v4 }
 0xd84   : > { %2860 = vmatprep.subr.bf16.mxu1 %v3408_v1 }
 0xd92   : > { %v1346_v28 = vpop.permute.xlu0 %1345 }
 0xd93   : > { %vm1347_vm8 = vcmp.eq.s32.totalorder %v3720_v13, %v1346_v28 }
 0xd94   : > { %v1348_v29 = vsel %vm1347_vm8, 1.0, %v3408_v1 }
 0xd95   : > { %v1349_v30 = vpack.c.bf16 %v1348_v29, %v1348_v29 }
 0xd97   : > { %2849 = vmatmul.mubr.msk.bf16.vlgmr.msra.gmra.mrb[32].mxu0 %vm437_vm3, %v1349_v30 }
 0xd98   : > { %2869 = vmatpush3.bf16.msra.mxu0 %v3728_v25  ;;  %2872 = vmatprep.mubr.msk.bf16.mxu0 %vm3409_vm0, %v3408_v1 }
 0xd99   : > { %2870 = vmatprep.subr.bf16.mxu0 %v3408_v1 }
 0xd9c   : > { %2871 = vmatpush3.bf16.msra.mxu0 %v3731_v26 }
 0xd9d   : > { %2888 = vmatprep.subr.bf16.mxu0 %v3408_v1 }
 0xe51   : > { %v1321_v19 = vpop.f32.mrb[28].mxu1 }
 0xe52   : > { %1328 = vrot.lane.b32.xlu1 %v1321_v19, %s3413_s27  ;;  %v2838_v20 = vpop.f32.mrb[29].mxu1 }
 0xe53   : > { %v1324_v21 = vpop.f32.mrb[30].mxu1 }
 0xe54   : > { %v2839_v22 = vpop.f32.mrb[31].mxu1 }
 0xe6a   : > { %v1387_v41 = vpop.f32.mrb[32].mxu0 }
 0xe6b   : > { %v2850_v42 = vpop.f32.mrb[33].mxu0 }
 0xe6c   : > { %v1390_v43 = vpop.f32.mrb[34].mxu0 }
 0xe6d   : > { %v2851_v45 = vpop.f32.mrb[35].mxu0 }
 0xec4   : > { %v1329_v24 = vpop.permute.xlu1 %1328 }
 0xec5   : > { %v1331_v27 = vadd.f32 %v1329_v24, %v1167_v46 }
 0xec7   : > { %3157 = vtanh.f32 %v1331_v27 }
 0xec8   : > { %3159 = vpow2.f32 %v2535_v33 }
 0xed1   : > { %v3158_v31 = vpop.eup %3157 }
 0xed2   : > { %v1336_v32 = vsub.f32 %v3158_v31, %v1334_v23  ;;  %v3160_v34 = vpop.eup %3159 }
 0xed3   : > { %v1261_v35 = vadd.f32 1.0, %v3160_v34 }
 0xed4   : > { %1338 = vrot.lane.b32.xlu1 %v1336_v32, %s3413_s27 }
 0xed5   : > { %3161 = vrcp.f32 %v1261_v35 }
 0xedf   : > { %v3162_v36 = vpop.eup %3161 }
 0xf46   : > { %v1339_v37 = vpop.permute.xlu1 %1338 }
 0xf47   : > { %v1341_v38 = vmul.f32 %v3162_v36, %v1339_v37 }
 0xf49   : > { %v3900_v39 = vadd.f32 %v1341_v38, %v3852_v44 }
 0xf4b   : > { %v1393_v40 = vpack.c.bf16 %v3900_v39, %v3900_v39 }
 0xf4d   : > { %2857 = vmatmul.mubr.msk.bf16.vlgmr.msra.gmra.mrb[32].mxu1 %vm497_vm4, %v1393_v40 }
 0xf4e   : > { %2861 = vmatpush3.bf16.msra.mxu1 %v3685_v6  ;;  %2864 = vmatprep.mubr.msk.bf16.mxu1 %vm3409_vm0, %v3408_v1 }
 0xf4f   : > { %2862 = vmatprep.subr.bf16.mxu1 %v3408_v1 }
 0xf52   : > { %2863 = vmatpush3.bf16.msra.mxu1 %v3692_v8 }
 0xf53   : > { %2876 = vmatprep.subr.bf16.mxu1 %v3408_v1 }
 0xf55   : > { %2865 = vmatmul.mubr.msk.bf16.vlgmr.msra.gmra.mrb[36].mxu1 %vm497_vm4, %v1393_v40 }
 0xf56   : > { %2877 = vmatpush3.bf16.msra.mxu1 %v3682_v5  ;;  %2884 = vmatprep.mubr.msk.bf16.mxu1 %vm3409_vm0, %v3408_v1 }
 0xf57   : > { %2878 = vmatprep.subr.bf16.mxu1 %v3408_v1 }
 0xf5a   : > { %2879 = vmatpush3.bf16.msra.mxu1 %v3688_v7 }
 0xf5b   : > { %2880 = vmatprep.subr.bf16.mxu1 %v3408_v1 }
 0xf5e   : > { %2881 = vmatpush3.bf16.msra.mxu1 %v3694_v9 }
 0xf5f   : > { %2882 = vmatprep.subr.bf16.mxu1 %v3408_v1 }
 0xf62   : > { %2883 = vmatpush3.bf16.msra.mxu1 %v3706_v11 }
 0xf63   : > { %2904 = vmatprep.subr.bf16.mxu1 %v3408_v1 }
0x1020   : > { %v1431_v46 = vpop.f32.mrb[32].mxu1 }
0x1021   : > { %v1477_v47 = vadd.f32 %v1431_v46, %v1387_v41  ;;  %v2858_v48 = vpop.f32.mrb[33].mxu1 }
0x1022   : > { %v1434_v49 = vpop.f32.mrb[34].mxu1 }
0x1023   : > { %v2859_v51 = vpop.f32.mrb[35].mxu1  ;;  %v2541_v24 = vmul.f32 -1.442695, %v1477_v47 }
0x1028   : > { %v1471_v52 = vpop.f32.mrb[36].mxu1 }
0x1029   : > { %1485 = vrot.lane.b32.xlu1 %v1471_v52, %s3410_s22  ;;  %v2866_v53 = vpop.f32.mrb[37].mxu1 }
0x102a   : > { %v1474_v54 = vpop.f32.mrb[38].mxu1 }
0x102b   : > { %v2867_v55 = vpop.f32.mrb[39].mxu1 }
0x102c   : > { %v3980_v55 = vld [vmem:[%s4161_s2] sm:$0xff]  }
0x102d   : > { %1496 = vrot.lane.b32.xlu1 %v3900_v39, %s3410_s22 }
0x109b   : > { %v1486_v56 = vpop.permute.xlu1 %1485 }
0x109c   : > { %v1488_v58 = vadd.f32 %v1486_v56, %v1387_v41  ;;  %v3989_v56 = vld [vmem:[%s4161_s2 + $0x8] sm:$0xff]  }
0x109e   : > { %v2542_v59 = vmul.f32 -1.442695, %v1488_v58  ;;  %v3418_v58 = vmov 6  }
0x109f   : > { %v1497_v63 = vpop.permute.xlu1 %1496 }
0x10a0   : > { %3163 = vpow2.f32 %v2542_v59  ;;  %v3994_v59 = vld [vmem:[%s3664_s16] sm:$0xff]  ;;  %s3329_s16 = sshll.u32 %s3420_s14, 4  ;;  %s3330_s16 = int_to_ptr.vmem [resolvable:$false] %s3329_s16 }
0x10a1   : > { %s3331_s11 = scalar_lea.vmem %s3330_s16, 256 }
0x10aa   : > { %v3164_v60 = vpop.eup %3163 }
0x10ab   : > { %v1492_v61 = vadd.f32 1.0, %v3164_v60 }
0x10ad   : > { %3165 = vrcp.f32 %v1492_v61 }
0x10b7   : > { %v3166_v62 = vpop.eup %3165 }
0x10b8   : > { %v1499_v0 = vmul.f32 %v3166_v62, %v1497_v63 }
0x10ba   : > { %v1500_v10 = vpack.c.bf16 %v1499_v0, %v1499_v0 }
0x10bc   : > { %1502 = vrot.lane.b32.xlu0 %v1500_v10, %s3411_s25 }
0x10c0   : > { %1553 = vrot.lane.b32.xlu0 %v3900_v39, %s3413_s27 }
0x10c4   : > { %1565 = vperm.xlu0 %3104, %v3667_v2  }
0x10c8   : > { %3105 = vset.pattern.permute.xlu0 %v3418_v58 }
0x112e   : > { %v1503_v12 = vpop.permute.xlu0 %1502 }
0x112f   : > { %2873 = vmatmul.mubr.msk.bf16.vlgmr.msra.gmra.mrb[36].mxu0 %vm497_vm4, %v1503_v12 }
0x1130   : > { %2889 = vmatpush3.bf16.msra.mxu0 %v3673_v3  ;;  %2892 = vmatprep.mubr.msk.bf16.mxu0 %vm3409_vm0, %v3408_v1 }
0x1131   : > { %2890 = vmatprep.subr.bf16.mxu0 %v3408_v1 }
0x1132   : > { %v1554_v3 = vpop.permute.xlu0 %1553 }
0x1134   : > { %2891 = vmatpush3.bf16.msra.mxu0 %v3679_v4 }
0x1135   : > { %2896 = vmatprep.subr.bf16.mxu0 %v3408_v1 }
0x1143   : > { %v1566_v21 = vpop.permute.xlu0 %1565 }
0x1144   : > { %vm1567_vm9 = vcmp.eq.s32.totalorder %v3720_v13, %v1566_v21 }
0x1145   : > { %v1568_v4 = vsel %vm1567_vm9, 1.0, %v3408_v1 }
0x1146   : > { %v1569_v22 = vpack.c.bf16 %v1568_v4, %v1568_v4 }
0x1148   : > { %2885 = vmatmul.mubr.msk.bf16.vlgmr.msra.gmra.mrb[40].mxu1 %vm437_vm3, %v1569_v22 }
0x1149   : > { %2905 = vmatpush3.bf16.msra.mxu1 %v3728_v25  ;;  %2908 = vmatprep.mubr.msk.bf16.mxu1 %vm3409_vm0, %v3408_v1 }
0x114a   : > { %2906 = vmatprep.subr.bf16.mxu1 %v3408_v1 }
0x114d   : > { %2907 = vmatpush3.bf16.msra.mxu1 %v3731_v26 }
0x114e   : > { %2924 = vmatprep.subr.bf16.mxu1 %v3408_v1 }
0x1202   : > { %v1541_v15 = vpop.f32.mrb[36].mxu0 }
0x1203   : > { %1548 = vrot.lane.b32.xlu1 %v1541_v15, %s3413_s27  ;;  %v2874_v16 = vpop.f32.mrb[37].mxu0 }
0x1204   : > { %v1544_v17 = vpop.f32.mrb[38].mxu0 }
0x1205   : > { %v2875_v18 = vpop.f32.mrb[39].mxu0 }
0x1275   : > { %v1549_v19 = vpop.permute.xlu1 %1548 }
0x1276   : > { %v1551_v20 = vadd.f32 %v1549_v19, %v1387_v41 }
0x1278   : > { %3167 = vtanh.f32 %v1551_v20 }
0x1279   : > { %3169 = vpow2.f32 %v2541_v24  ;;  %v3208_v24 = vld [vmem:[#allocation2] sm:$0xff]  }
0x1282   : > { %v3168_v2 = vpop.eup %3167 }
0x1283   : > { %v1556_v23 = vsub.f32 %v3168_v2, %v1554_v3  ;;  %v3170_v27 = vpop.eup %3169 }
0x1284   : > { %v1481_v28 = vadd.f32 1.0, %v3170_v27  ;;  %v3209_v27 = vld [vmem:[#allocation2 + $0x8] sm:$0xff]  }
0x1285   : > { %1558 = vrot.lane.b32.xlu1 %v1556_v23, %s3413_s27  ;;  %v4020_v23 = vld [vmem:[#allocation5 + $0x8] sm:$0xff]  }
0x1286   : > { %3171 = vrcp.f32 %v1481_v28  ;;  %v3210_v28 = vld [vmem:[#allocation2 + $0x10] sm:$0xff]  }
0x1290   : > { %v3172_v29 = vpop.eup %3171 }
0x12f7   : > { %v1559_v30 = vpop.permute.xlu1 %1558 }
0x12f8   : > { %v1561_v31 = vmul.f32 %v3172_v29, %v1559_v30 }
0x12fa   : > { %v3948_v32 = vadd.f32 %v1561_v31, %v3900_v39 }
0x12fc   : > { %v1613_v33 = vpack.c.bf16 %v3948_v32, %v3948_v32 }
0x12fe   : > { %2893 = vmatmul.mubr.msk.bf16.vlgmr.msra.gmra.mrb[40].mxu0 %vm497_vm4, %v1613_v33 }
0x12ff   : > { %2897 = vmatpush3.bf16.msra.mxu0 %v3685_v6  ;;  %2900 = vmatprep.mubr.msk.bf16.mxu0 %vm3409_vm0, %v3408_v1  ;;  %v1607_v6 = vpop.f32.mrb[40].mxu1 }
0x1300   : > { %2898 = vmatprep.subr.bf16.mxu0 %v3408_v1 }
0x1303   : > { %2899 = vmatpush3.bf16.msra.mxu0 %v3692_v8  ;;  %v2886_v8 = vpop.f32.mrb[41].mxu1 }
0x1304   : > { %2912 = vmatprep.subr.bf16.mxu0 %v3408_v1 }
0x1306   : > { %2901 = vmatmul.mubr.msk.bf16.vlgmr.msra.gmra.mrb[44].mxu0 %vm497_vm4, %v1613_v33 }
0x1307   : > { %2913 = vmatpush3.bf16.msra.mxu0 %v3682_v5  ;;  %2920 = vmatprep.mubr.msk.bf16.mxu0 %vm3409_vm0, %v3408_v1  ;;  %v1610_v5 = vpop.f32.mrb[42].mxu1 }
0x1308   : > { %2914 = vmatprep.subr.bf16.mxu0 %v3408_v1  ;;  %v2887_v34 = vpop.f32.mrb[43].mxu1 }
0x130b   : > { %2915 = vmatpush3.bf16.msra.mxu0 %v3688_v7 }
0x130c   : > { %2916 = vmatprep.subr.bf16.mxu0 %v3408_v1 }
0x130f   : > { %2917 = vmatpush3.bf16.msra.mxu0 %v3694_v9 }
0x1310   : > { %2918 = vmatprep.subr.bf16.mxu0 %v3408_v1 }
0x1313   : > { %2919 = vmatpush3.bf16.msra.mxu0 %v3706_v11 }
0x1314   : > { %2940 = vmatprep.subr.bf16.mxu0 %v3408_v1 }
0x13d1   : > { %v1651_v35 = vpop.f32.mrb[40].mxu0 }
0x13d2   : > { %v1697_v36 = vadd.f32 %v1651_v35, %v1607_v6  ;;  %v2894_v37 = vpop.f32.mrb[41].mxu0 }
0x13d3   : > { %v1654_v38 = vpop.f32.mrb[42].mxu0 }
0x13d4   : > { %v2895_v40 = vpop.f32.mrb[43].mxu0  ;;  %v2547_v3 = vmul.f32 -1.442695, %v1697_v36 }
0x13d9   : > { %v1691_v7 = vpop.f32.mrb[44].mxu0 }
0x13da   : > { %1705 = vrot.lane.b32.xlu1 %v1691_v7, %s3410_s22  ;;  %v2902_v41 = vpop.f32.mrb[45].mxu0 }
0x13db   : > { %v1694_v9 = vpop.f32.mrb[46].mxu0 }
0x13dc   : > { %v2903_v42 = vpop.f32.mrb[47].mxu0 }
0x13de   : > { %1716 = vrot.lane.b32.xlu1 %v3948_v32, %s3410_s22 }
0x144c   : > { %v1706_v43 = vpop.permute.xlu1 %1705 }
0x144d   : > { %v1708_v45 = vadd.f32 %v1706_v43, %v1607_v6 }
0x144f   : > { %v2548_v46 = vmul.f32 -1.442695, %v1708_v45 }
0x1450   : > { %v1717_v51 = vpop.permute.xlu1 %1716 }
0x1451   : > { %3173 = vpow2.f32 %v2548_v46 }
0x145b   : > { %v3174_v47 = vpop.eup %3173 }
0x145c   : > { %v1712_v48 = vadd.f32 1.0, %v3174_v47 }
0x145e   : > { %3175 = vrcp.f32 %v1712_v48 }
0x1468   : > { %v3176_v49 = vpop.eup %3175 }
0x1469   : > { %v1719_v52 = vmul.f32 %v3176_v49, %v1717_v51  ;;  %v3419_v49 = vmov 7  }
0x146b   : > { %v1720_v53 = vpack.c.bf16 %v1719_v52, %v1719_v52 }
0x146d   : > { %1722 = vrot.lane.b32.xlu0 %v1720_v53, %s3411_s25 }
0x1471   : > { %1773 = vrot.lane.b32.xlu0 %v3948_v32, %s3413_s27 }
0x1475   : > { %1785 = vperm.xlu0 %3105, %v3994_v59  }
0x1479   : > { %3106 = vset.pattern.permute.xlu0 %v3419_v49 }
0x14df   : > { %v1723_v54 = vpop.permute.xlu0 %1722 }
0x14e0   : > { %2909 = vmatmul.mubr.msk.bf16.vlgmr.msra.gmra.mrb[44].mxu1 %vm497_vm4, %v1723_v54 }
0x14e1   : > { %2925 = vmatpush3.bf16.msra.mxu1 %v3980_v55  ;;  %2928 = vmatprep.mubr.msk.bf16.mxu1 %vm3409_vm0, %v3408_v1 }
0x14e2   : > { %2926 = vmatprep.subr.bf16.mxu1 %v3408_v1 }
0x14e3   : > { %v1774_v0 = vpop.permute.xlu0 %1773 }
0x14e5   : > { %2927 = vmatpush3.bf16.msra.mxu1 %v3989_v56 }
0x14e6   : > { %2932 = vmatprep.subr.bf16.mxu1 %v3408_v1 }
0x14f4   : > { %v1786_v14 = vpop.permute.xlu0 %1785 }
0x14f5   : > { %vm1787_vm10 = vcmp.eq.s32.totalorder %v3720_v13, %v1786_v14 }
0x14f6   : > { %v1788_v15 = vsel %vm1787_vm10, 1.0, %v3408_v1 }
0x14f7   : > { %v1789_v16 = vpack.c.bf16 %v1788_v15, %v1788_v15 }
0x14f9   : > { %2921 = vmatmul.mubr.msk.bf16.vlgmr.msra.gmra.mrb[48].mxu0 %vm437_vm3, %v1789_v16 }
0x14fa   : > { %2941 = vmatpush3.bf16.msra.mxu0 %v3728_v25  ;;  %2944 = vmatprep.mubr.msk.bf16.mxu0 %vm3409_vm0, %v3408_v1 }
0x14fb   : > { %2942 = vmatprep.subr.bf16.mxu0 %v3408_v1 }
0x14fe   : > { %2943 = vmatpush3.bf16.msra.mxu0 %v3731_v26  ;;  %v4014_v26 = vld [vmem:[#allocation5] sm:$0xff]  }
0x14ff   : > { %2960 = vmatprep.subr.bf16.mxu0 %v3408_v1 }
0x15b3   : > { %v1761_v60 = vpop.f32.mrb[44].mxu1 }
0x15b4   : > { %1768 = vrot.lane.b32.xlu1 %v1761_v60, %s3413_s27  ;;  %v2910_v61 = vpop.f32.mrb[45].mxu1 }
0x15b5   : > { %v1764_v62 = vpop.f32.mrb[46].mxu1 }
0x15b6   : > { %v2911_v63 = vpop.f32.mrb[47].mxu1 }
0x15b7   : > { %v3211_v63 = vld [vmem:[#allocation7] sm:$0xff]  }
0x15cc   : > { %v1827_v29 = vpop.f32.mrb[48].mxu0 }
0x15cd   : > { %v2922_v30 = vpop.f32.mrb[49].mxu0 }
0x15ce   : > { %v1830_v31 = vpop.f32.mrb[50].mxu0 }
0x15cf   : > { %v2923_v33 = vpop.f32.mrb[51].mxu0 }
0x1626   : > { %v1769_v10 = vpop.permute.xlu1 %1768 }
0x1627   : > { %v1771_v12 = vadd.f32 %v1769_v10, %v1607_v6  ;;  %v3212_v10 = vld [vmem:[#allocation7 + $0x8] sm:$0xff]  }
0x1629   : > { %3177 = vtanh.f32 %v1771_v12 }
0x162a   : > { %3179 = vpow2.f32 %v2547_v3 }
0x1633   : > { %v3178_v17 = vpop.eup %3177 }
0x1634   : > { %v1776_v18 = vsub.f32 %v3178_v17, %v1774_v0  ;;  %v3180_v19 = vpop.eup %3179 }
0x1635   : > { %v1701_v20 = vadd.f32 1.0, %v3180_v19 }
0x1636   : > { %1778 = vrot.lane.b32.xlu1 %v1776_v18, %s3413_s27 }
0x1637   : > { %3181 = vrcp.f32 %v1701_v20 }
0x1641   : > { %v3182_v21 = vpop.eup %3181 }
0x16a8   : > { %v1779_v25 = vpop.permute.xlu1 %1778 }
0x16a9   : > { %v1781_v4 = vmul.f32 %v3182_v21, %v1779_v25 }
0x16ab   : > { %v4009_v22 = vadd.f32 %v1781_v4, %v3948_v32 }
0x16ad   : > { %v1833_v2 = vpack.c.bf16 %v4009_v22, %v4009_v22 }
0x16af   : > { %2929 = vmatmul.mubr.msk.bf16.vlgmr.msra.gmra.mrb[48].mxu1 %vm497_vm4, %v1833_v2 }
0x16b0   : > { %2933 = vmatpush3.bf16.msra.mxu1 %v4014_v26  ;;  %2936 = vmatprep.mubr.msk.bf16.mxu1 %vm3409_vm0, %v3408_v1 }
0x16b1   : > { %2934 = vmatprep.subr.bf16.mxu1 %v3408_v1 }
0x16b4   : > { %2935 = vmatpush3.bf16.msra.mxu1 %v4020_v23 }
0x16b5   : > { %2948 = vmatprep.subr.bf16.mxu1 %v3408_v1 }
0x16b7   : > { %2937 = vmatmul.mubr.msk.bf16.vlgmr.msra.gmra.mrb[52].mxu1 %vm497_vm4, %v1833_v2 }
0x16b8   : > { %2949 = vmatpush3.bf16.msra.mxu1 %v3208_v24  ;;  %2956 = vmatprep.mubr.msk.bf16.mxu1 %vm3409_vm0, %v3408_v1 }
0x16b9   : > { %2950 = vmatprep.subr.bf16.mxu1 %v3408_v1 }
0x16bc   : > { %2951 = vmatpush3.bf16.msra.mxu1 %v3209_v27 }
0x16bd   : > { %2952 = vmatprep.subr.bf16.mxu1 %v3408_v1 }
0x16c0   : > { %2953 = vmatpush3.bf16.msra.mxu1 %v3210_v28 }
0x16c1   : > { %2954 = vmatprep.subr.bf16.mxu1 %v3408_v1 }
0x16c4   : > { %2955 = vmatpush3.bf16.msra.mxu1 %v3706_v11 }
0x16c5   : > { %2976 = vmatprep.subr.bf16.mxu1 %v3408_v1 }
0x1782   : > { %v1871_v6 = vpop.f32.mrb[48].mxu1 }
0x1783   : > { %v1917_v8 = vadd.f32 %v1871_v6, %v1827_v29  ;;  %v2930_v5 = vpop.f32.mrb[49].mxu1 }
0x1784   : > { %v1874_v34 = vpop.f32.mrb[50].mxu1 }
0x1785   : > { %v2931_v35 = vpop.f32.mrb[51].mxu1 }
0x178a   : > { %v1911_v36 = vpop.f32.mrb[52].mxu1 }
0x178b   : > { %1925 = vrot.lane.b32.xlu1 %v1911_v36, %s3410_s22  ;;  %v2938_v37 = vpop.f32.mrb[53].mxu1 }
0x178c   : > { %v1914_v38 = vpop.f32.mrb[54].mxu1 }
0x178d   : > { %v2939_v40 = vpop.f32.mrb[55].mxu1 }
0x178f   : > { %1936 = vrot.lane.b32.xlu1 %v4009_v22, %s3410_s22 }
0x17fd   : > { %v1926_v11 = vpop.permute.xlu1 %1925 }
0x17fe   : > { %v1928_v7 = vadd.f32 %v1926_v11, %v1827_v29 }
0x1800   : > { %v2554_v41 = vmul.f32 -1.442695, %v1928_v7 }
0x1801   : > { %v1937_v45 = vpop.permute.xlu1 %1936 }
0x1802   : > { %3183 = vpow2.f32 %v2554_v41 }
0x180c   : > { %v3184_v9 = vpop.eup %3183 }
0x180d   : > { %v1932_v42 = vadd.f32 1.0, %v3184_v9 }
0x180f   : > { %3185 = vrcp.f32 %v1932_v42 }
0x1819   : > { %v3186_v43 = vpop.eup %3185 }
0x181a   : > { %v1939_v46 = vmul.f32 %v3186_v43, %v1937_v45  ;;  %v3117_v43 = vld [vmem:[#allocation8] sm:$0xff]   ;;  %v3118_v45 = vld [vmem:[#allocation8 + $0x8] sm:$0xff]  }
0x181c   : > { %v1940_v47 = vpack.c.bf16 %v1939_v46, %v1939_v46 }
0x181e   : > { %1942 = vrot.lane.b32.xlu0 %v1940_v47, %s3411_s25 }
0x1822   : > { %1993 = vrot.lane.b32.xlu0 %v4009_v22, %s3413_s27 }
0x1826   : > { %2005 = vperm.xlu0 %3106, %v3994_v59  }
0x1890   : > { %v1943_v48 = vpop.permute.xlu0 %1942 }
0x1891   : > { %2945 = vmatmul.mubr.msk.bf16.vlgmr.msra.gmra.mrb[52].mxu0 %vm497_vm4, %v1943_v48  ;;  %v3119_v48 = vld [vmem:[%s4166_s7] sm:$0xff]  }
0x1892   : > { %2961 = vmatpush3.bf16.msra.mxu0 %v3980_v55  ;;  %2964 = vmatprep.mubr.msk.bf16.mxu0 %vm3409_vm0, %v3408_v1 }
0x1893   : > { %2962 = vmatprep.subr.bf16.mxu0 %v3408_v1 }
0x1894   : > { %v1994_v55 = vpop.permute.xlu0 %1993 }
0x1896   : > { %2963 = vmatpush3.bf16.msra.mxu0 %v3989_v56 }
0x1897   : > { %2968 = vmatprep.subr.bf16.mxu0 %v3408_v1 }
0x18a5   : > { %v2006_v61 = vpop.permute.xlu0 %2005 }
0x18a6   : > { %vm2007_vm11 = vcmp.eq.s32.totalorder %v3720_v13, %v2006_v61  ;;  %v2553_v13 = vmul.f32 -1.442695, %v1917_v8 }
0x18a7   : > { %v2008_v56 = vsel %vm2007_vm11, 1.0, %v3408_v1 }
0x18a8   : > { %v2009_v62 = vpack.c.bf16 %v2008_v56, %v2008_v56 }
0x18aa   : > { %2957 = vmatmul.mubr.msk.bf16.vlgmr.msra.gmra.mrb[56].mxu1 %vm437_vm3, %v2009_v62 }
0x18ab   : > { %2977 = vmatpush3.bf16.msra.mxu1 %v3211_v63  ;;  %2980 = vmatprep.mubr.msk.bf16.mxu1 %vm3409_vm0, %v3408_v1 }
0x18ac   : > { %2978 = vmatprep.subr.bf16.mxu1 %v3408_v1 }
0x18af   : > { %2979 = vmatpush3.bf16.msra.mxu1 %v3212_v10 }
0x18b0   : > { %2992 = vmatprep.subr.bf16.mxu1 %v3408_v1 }
0x1964   : > { %v1981_v51 = vpop.f32.mrb[52].mxu0 }
0x1965   : > { %1988 = vrot.lane.b32.xlu1 %v1981_v51, %s3413_s27  ;;  %v2946_v52 = vpop.f32.mrb[53].mxu0  ;;  %v3120_v51 = vld [vmem:[%s4166_s7 + $0x8] sm:$0xff]  }
0x1966   : > { %v1984_v53 = vpop.f32.mrb[54].mxu0 }
0x1967   : > { %v2947_v54 = vpop.f32.mrb[55].mxu0 }
0x197d   : > { %v2047_v19 = vpop.f32.mrb[56].mxu1 }
0x197e   : > { %v2958_v20 = vpop.f32.mrb[57].mxu1 }
0x197f   : > { %v2050_v21 = vpop.f32.mrb[58].mxu1 }
0x1980   : > { %v2959_v25 = vpop.f32.mrb[59].mxu1 }
0x19d7   : > { %v1989_v58 = vpop.permute.xlu1 %1988 }
0x19d8   : > { %v1991_v60 = vadd.f32 %v1989_v58, %v1827_v29 }
0x19da   : > { %3187 = vtanh.f32 %v1991_v60 }
0x19db   : > { %3189 = vpow2.f32 %v2553_v13 }
0x19e4   : > { %v3188_v59 = vpop.eup %3187 }
0x19e5   : > { %v1996_v0 = vsub.f32 %v3188_v59, %v1994_v55  ;;  %v3190_v12 = vpop.eup %3189  ;;  %v903_v55 = vadd.f32 %v3804_v50, %v3756_v57  ;;  %v3121_v57 = vld [vmem:[%s4166_s7 + $0x10] sm:$0xff]   ;;  %v3122_v50 = vld [vmem:[%s4166_s7 + $0x18] sm:$0xff]  }
0x19e6   : > { %v1921_v14 = vadd.f32 1.0, %v3190_v12 }
0x19e7   : > { %1998 = vrot.lane.b32.xlu1 %v1996_v0, %s3413_s27  ;;  %v1123_v58 = vadd.f32 %v3852_v44, %v903_v55  ;;  %v2562_v44 = vld [vmem:[%s4165_s6] ss:$0 sm:$0xff] }
0x19e8   : > { %3191 = vrcp.f32 %v1921_v14 }
0x19e9   : > { %v1343_v60 = vadd.f32 %v3900_v39, %v1123_v58 }
0x19eb   : > { %v1563_v61 = vadd.f32 %v3948_v32, %v1343_v60 }
0x19ed   : > { %v1783_v63 = vadd.f32 %v4009_v22, %v1563_v61 }
0x19f2   : > { %v3192_v15 = vpop.eup %3191 }
0x1a59   : > { %v1999_v16 = vpop.permute.xlu1 %1998 }
0x1a5a   : > { %v2001_v17 = vmul.f32 %v3192_v15, %v1999_v16 }
0x1a5c   : > { %v4056_v18 = vadd.f32 %v2001_v17, %v4009_v22 }
0x1a5e   : > { %v2053_v3 = vpack.c.bf16 %v4056_v18, %v4056_v18  ;;  %v2003_v0 = vadd.f32 %v4056_v18, %v1783_v63 }
0x1a60   : > { %2965 = vmatmul.mubr.msk.bf16.vlgmr.msra.gmra.mrb[56].mxu0 %vm497_vm4, %v2053_v3 }
0x1a61   : > { %2969 = vmatpush3.bf16.msra.mxu0 %v4014_v26  ;;  %2972 = vmatprep.mubr.msk.bf16.mxu0 %vm3409_vm0, %v3408_v1 }
0x1a62   : > { %2970 = vmatprep.subr.bf16.mxu0 %v3408_v1 }
0x1a65   : > { %2971 = vmatpush3.bf16.msra.mxu0 %v4020_v23 }
0x1a66   : > { %2984 = vmatprep.subr.bf16.mxu0 %v3408_v1 }
0x1a68   : > { %2973 = vmatmul.mubr.msk.bf16.vlgmr.msra.gmra.mrb[60].mxu0 %vm497_vm4, %v2053_v3 }
0x1a69   : > { %2988 = vmatprep.mubr.msk.bf16.mxu0 %vm3409_vm0, %v3408_v1  ;;  %2985 = vmatpush3.bf16.msra.mxu0 %v3117_v43 }
0x1a6a   : > { %2986 = vmatprep.subr.bf16.mxu0 %v3408_v1 }
0x1a6d   : > { %2987 = vmatpush3.bf16.msra.mxu0 %v3118_v45 }
0x1b33   : > { %v2091_v4 = vpop.f32.mrb[56].mxu0 }
0x1b34   : > { %v2137_v2 = vadd.f32 %v2091_v4, %v2047_v19  ;;  %v2966_v26 = vpop.f32.mrb[57].mxu0 }
0x1b35   : > { %v2094_v24 = vpop.f32.mrb[58].mxu0 }
0x1b36   : > { %v2967_v27 = vpop.f32.mrb[59].mxu0  ;;  %v2559_v52 = vmul.f32 -1.442695, %v2137_v2 }
0x1b3b   : > { %v2131_v28 = vpop.f32.mrb[60].mxu0 }
0x1b3c   : > { %2145 = vrot.lane.b32.xlu1 %v2131_v28, %s3410_s22  ;;  %v2974_v23 = vpop.f32.mrb[61].mxu0 }
0x1b3d   : > { %v2134_v29 = vpop.f32.mrb[62].mxu0 }
0x1b3e   : > { %v2975_v30 = vpop.f32.mrb[63].mxu0 }
0x1b40   : > { %2156 = vrot.lane.b32.xlu1 %v4056_v18, %s3410_s22  ;;  %s380_s22 = sand.u32 1, %s3391_s10  }
0x1b41   : > { %s2379_s24 = scalar_lea.sflag [#allocation4], %s380_s22 }
0x1bae   : > { %v2146_v31 = vpop.permute.xlu1 %2145 }
0x1baf   : > { %v2148_v33 = vadd.f32 %v2146_v31, %v2047_v19 }
0x1bb1   : > { %v2560_v6 = vmul.f32 -1.442695, %v2148_v33 }
0x1bb2   : > { %v2157_v35 = vpop.permute.xlu1 %2156 }
0x1bb3   : > { %3193 = vpow2.f32 %v2560_v6 }
0x1bbd   : > { %v3194_v8 = vpop.eup %3193 }
0x1bbe   : > { %v2152_v5 = vadd.f32 1.0, %v3194_v8 }
0x1bc0   : > { %3195 = vrcp.f32 %v2152_v5 }
0x1bca   : > { %v3196_v34 = vpop.eup %3195 }
0x1bcb   : > { %v2159_v36 = vmul.f32 %v3196_v34, %v2157_v35 }
0x1bcd   : > { %v2160_v37 = vpack.c.bf16 %v2159_v36, %v2159_v36 }
0x1bcf   : > { %2162 = vrot.lane.b32.xlu0 %v2160_v37, %s3411_s25  ;;  %s2504_s25 = sshll.u32 %s380_s22, 3 }
0x1bd0   : > { %s382_s28 = scalar_lea.vmem [#allocation10], %s2504_s25 }
0x1bd1   : > { %s2392_s26 = sshll.u32 %s382_s28, 4  ;;  %s4119_s26 = int_to_ptr.vmem [resolvable:$true] %s2392_s26 }
0x1bd2   : > { %s3325_s13 = scalar_lea.vmem %s4119_s26, 128  ;;  %p3332_p6 = scmp.lt.s32.totalorder %s4119_s26, %s3330_s16 }
0x1bd3   : > { %2213 = vrot.lane.b32.xlu0 %v4056_v18, %s3413_s27  ;;  %p3326_p8 = scmp.ne.s32.totalorder %s4119_s26, %s3325_s13  ;;  %p3333_p9 = scmp.lt.s32.totalorder %s3331_s11, %s3325_s13 }
0x1bd5   : > { %p3327_p13 = pnand %p3326_p8, %p4194_p11  ;;  %p3334_p5 = por %p3333_p9, %p3332_p6 }
0x1bd7   : > { %p3328_p1 = pneg %p3327_p13 }
0x1bd9   : > { %p3335_p0 = pnand %p3334_p5, %p3328_p1 }
0x1c41   : > { %v2163_v38 = vpop.permute.xlu0 %2162 }
0x1c42   : > { %2981 = vmatmul.mubr.msk.bf16.vlgmr.msra.gmra.mrb[60].mxu1 %vm497_vm4, %v2163_v38 }
0x1c43   : > { %3000 = vmatprep.mubr.msk.bf16.mxu1 %vm3409_vm0, %v3408_v1  ;;  %2993 = vmatpush3.bf16.msra.mxu1 %v3119_v48 }
0x1c44   : > { %2994 = vmatprep.subr.bf16.mxu1 %v3408_v1 }
0x1c45   : > { %v2214_v47 = vpop.permute.xlu0 %2213 }
0x1c47   : > { %2995 = vmatpush3.bf16.msra.mxu1 %v3120_v51 }
0x1c48   : > { %2996 = vmatprep.subr.bf16.mxu1 %v3408_v1 }
0x1c4b   : > { %2997 = vmatpush3.bf16.msra.mxu1 %v3121_v57 }
0x1c4c   : > { %2998 = vmatprep.subr.bf16.mxu1 %v3408_v1  ;;  %v2566_v1 = vld [vmem:[%s4167_s8] ss:$0 sm:$0xff] }
0x1c4f   : > { %2999 = vmatpush3.bf16.msra.mxu1 %v3122_v50 }
0x1d15   : > { %v2201_v40 = vpop.f32.mrb[60].mxu1 }
0x1d16   : > { %2208 = vrot.lane.b32.xlu1 %v2201_v40, %s3413_s27  ;;  %v2982_v11 = vpop.f32.mrb[61].mxu1 }
0x1d17   : > { %v2204_v7 = vpop.f32.mrb[62].mxu1 }
0x1d18   : > { %v2983_v41 = vpop.f32.mrb[63].mxu1 }
0x1d88   : > { %v2209_v9 = vpop.permute.xlu1 %2208 }
0x1d89   : > { %v2211_v42 = vadd.f32 %v2209_v9, %v2047_v19 }
0x1d8b   : > { %3197 = vtanh.f32 %v2211_v42 }
0x1d8c   : > { %3199 = vpow2.f32 %v2559_v52 }
0x1d95   : > { %v3198_v46 = vpop.eup %3197 }
0x1d96   : > { %v2216_v49 = vsub.f32 %v3198_v46, %v2214_v47  ;;  %v3200_v53 = vpop.eup %3199 }
0x1d97   : > { %v2141_v54 = vadd.f32 1.0, %v3200_v53 }
0x1d98   : > { %2218 = vrot.lane.b32.xlu1 %v2216_v49, %s3413_s27 }
0x1d99   : > { %3201 = vrcp.f32 %v2141_v54 }
0x1da3   : > { %v3202_v56 = vpop.eup %3201 }
0x1e0a   : > { %v2219_v62 = vpop.permute.xlu1 %2218 }
0x1e0b   : > { %v2221_v59 = vmul.f32 %v3202_v56, %v2219_v62 }
0x1e0d   : > { %v2222_v10 = vadd.f32 %v2221_v59, %v4056_v18 }
0x1e0f   : > { %v2223_v13 = vadd.f32 %v2222_v10, %v2003_v0 }
0x1e11   : > { %v2224_v12 = vmul.f32 0.125, %v2223_v13 }
0x1e13   : > { %v2239_v14 = vpack.c.bf16 %v2224_v12, %v2224_v12 }
0x1e15   : > { %2989 = vmatmul.mubr.msk.bf16.vlgmr.msra.gmra.mrb[64].mxu0 %vm497_vm4, %v2239_v14 }
0x1ee8   : > { %v2295_v39 = vpop.f32.mrb[64].mxu0 }
0x1ee9   : > { %v2296_v32 = vadd.f32 %v2562_v44, %v2295_v39  ;;  %v2990_v22 = vpop.f32.mrb[65].mxu0 }
0x1eea   : > { %v2298_v15 = vpop.f32.mrb[66].mxu0 }
0x1eeb   : > { %v2301_v16 = vmax.f32 %v2296_v32, 0.0  ;;  %v2991_v17 = vpop.f32.mrb[67].mxu0 }
0x1eed   : > { %v2302_v18 = vpack.c.bf16 %v2301_v16, %v2301_v16 }
0x1eef   : > { %3001 = vmatmul.mubr.msk.bf16.vlgmr.msra.gmra.mrb[64].mxu1 %vm2333_vm12, %v2302_v18 }
0x1fc2   : > { %v2371_v3 = vpop.f32.mrb[64].mxu1 }
0x1fc3   : > { %v2372_v19 = vadd.f32 %v2566_v1, %v2371_v3  ;;  %v3002_v20 = vpop.f32.mrb[65].mxu1 }
0x1fc4   : > { %v2374_v21 = vpop.f32.mrb[66].mxu1 }
0x1fc5   : > { %2377 = vst [vmem:[%s382_s28] sm:$0xff] %v2372_v19  ;;  %v3003_v25 = vpop.f32.mrb[67].mxu1 }
0x1fc6   : > { %3338 = shalt.err (!%p3335_p0)
}
0x1fc7   : > { %s3339_s15 = scalar_lea.hbm %s4117_s21, 128  ;;  %s3343_s22 = scalar_lea.hbm %s4168_s9, 256 }
0x1fc8   : > { %p3340_p10 = scmp.ne.s32.totalorder %s4117_s21, %s3339_s15  ;;  %p3344_p4 = scmp.lt.u32.totalorder %s4117_s21, %s4168_s9 }
0x1fc9   : > { %p3345_p12 = scmp.lt.u32.totalorder %s3343_s22, %s3339_s15  ;;  %p3347_p8 = scmp.lt.u32.totalorder %s3339_s15, %s4117_s21 }
0x1fca   : > { %p3341_p2 = pnand %p3340_p10, %p4194_p11 }
0x1fcb   : > { %p3346_p7 = por %p3345_p12, %p3344_p4 }
0x1fcc   : > { %p3342_p3 = pneg %p3341_p2 }
0x1fcd   : > { %p3348_p13 = por %p3347_p8, %p3346_p7 }
0x1fcf   : > { %p3349_p1 = pnand %p3348_p13, %p3342_p3 }
0x1fd1   : > { %3352 = shalt.err (!%p3349_p1)
}
0x1fd2   : > { %3020 = dma.vmem_to_hbm [thread:$0]  (%p4194_p11), %s4119_s26, 128, %s4117_s21, %s2379_s24  }
0x1fd3 PF: > { %s4195_s29 = sld [smem:[#allocation15_spill]]  ;;  %s4196_s23 = sld [smem:[#allocation19_spill]] }
0x1fd4   : > { %p3047_p6 = scmp.ge.s32.totalorder %s3399_s12, 2 }
0x1fd9   : > { %s2404_s28 = sand.u32 1, %s4195_s29   ;;  %p4197_p9 = scmp.ne.s32.totalorder %s4196_s23, 0 }
0x1fda   : > { %s2405_s30 = scalar_lea.sflag [#allocation4], %s2404_s28 }
0x1fdb   : > { %p3036_p5 = pnand %p3047_p6, %p4197_p9 }
0x1fdd   : > { %3382 = dma.done.wait (!%p3036_p5), %s2405_s30, 128  }
0x1fde   : > { %3384 = vsyncadd (!%p3036_p5), %s2405_s30, 4294967168  ;;  %s4198_s12 = sld [smem:[#allocation17_spill]]  ;;  %s4199_s18 = sld [smem:[#allocation16_spill]] }
0x1fdf   : > { %s4200_s11 = sld [smem:[#allocation18_spill]]  ;;  %s4201_s30 = smov %s3391_s10 }
0x1fe4   : > { %p22_p0 = scmp.ge.s32.totalorder %s4198_s12, 4   ;;  %s4202_s10 = smov %s4199_s18 }
0x1fe6   :  { %24 = sbr.rel (!%p22_p0) target bundleno = 6 (0x6), region = 108 }
0x1fed   :  { %2410 = vsyncpa [#allocation3], 1 }
0x1fee   :  { %2412 = vsyncpa [#allocation3 + $0x1], 1 }
0x1fef   :  { %2413 = vsyncpa [#allocation6], 1 }
0x1ff0   :  { %2414 = vsyncpa [#allocation9], 1 }
0x1ff1   :  { %2415 = vsyncpa [#allocation4], 1 }
0x1ff2   :  { %2417 = vsyncpa [#allocation4 + $0x1], 1 }

</bundles_post_ra>
